<compile_context>
chip_gen: v6e
topology: v6e:2x2x1
jax: 0.10.0
libtpu: 0.0.40
codegen_flags: <defaults>
</compile_context>

<pallas_src>
import functools
import math

import jax
import jax.numpy as jnp
from jax.experimental import pallas as pl
from jax.experimental.pallas import tpu as pltpu

KERSIZE = (3, 5, 10)  # kersize=[3, 5, 10], subband_num=1 -> depthwise (groups=C)


def _se_kernel(x_ref, wconv_ref, bconv_ref, wcat_ref,
               w1t_ref, b1_ref, w2t_ref, b2_ref, o_ref,
               *, t_orig, kersize):
    x = x_ref[...]                                   # (Bblk, C, Tpad), input dtype
    xf = x.astype(jnp.float32)
    kmax = max(kersize)

    # ---- shared pooling statistics --------------------------------------
    # One full-row sum (zero-padded tail columns contribute nothing).
    total = jnp.sum(xf, axis=-1)                     # (Bblk, C)
    zero = jnp.zeros_like(total)

    # prefix[j] = sum of first j columns; suffix[m] = sum of last m valid
    # columns.  Only the first/last (kmax-1) <= 9 columns are touched; the
    # loops are static Python and fully unrolled.
    prefix = [zero]
    for j in range(kmax - 1):
        prefix.append(prefix[-1] + xf[:, :, j])
    suffix = [zero]
    for m in range(kmax - 1):
        suffix.append(suffix[-1] + xf[:, :, t_orig - 1 - m])

    wconv = wconv_ref[...].astype(jnp.float32)       # (sum(kersize), C)
    bconv = bconv_ref[...].astype(jnp.float32)       # (3, C)

    def branch(idx, off, k):
        # depthwise Conv1d (VALID) + AdaptiveAvgPool1d(1) + ReLU:
        #   mean_t(conv + bias) = (1/Tout) * sum_j w[:,j] * window_sum(j) + bias
        #   window_sum(j)       = total - prefix(j) - suffix(k-1-j)
        t_out = t_orig - k + 1
        acc = zero
        for j in range(k):                           # k <= 10, static unrolled
            win = total - prefix[j] - suffix[k - 1 - j]          # (Bblk, C)
            acc = acc + wconv[off + j, :][None, :] * win
        pooled = acc * (1.0 / t_out) + bconv[idx, :][None, :]
        return jnp.maximum(pooled, 0.0)                          # (Bblk, C)

    offs = (0, kersize[0], kersize[0] + kersize[1])
    small = branch(0, offs[0], kersize[0])
    middle = branch(1, offs[1], kersize[1])
    large = branch(2, offs[2], kersize[2])

    # ---- feature_concate_fc: Linear(3 -> 1) ------------------------------
    wc = wcat_ref[...].astype(jnp.float32)           # (1, 4): [w0, w1, w2, bias]
    squeeze = (small * wc[:, 0:1] + middle * wc[:, 1:2]
               + large * wc[:, 2:3] + wc[:, 3:4])    # (Bblk, C)

    # ---- squeeze / excite MLP (Bblk is the MXU M dimension) --------------
    h = jnp.dot(squeeze, w1t_ref[...].astype(jnp.float32),
                preferred_element_type=jnp.float32) + b1_ref[...].astype(jnp.float32)
    h = jnp.maximum(h, 0.0)                          # (Bblk, Cr)
    s = jnp.dot(h, w2t_ref[...].astype(jnp.float32),
                preferred_element_type=jnp.float32) + b2_ref[...].astype(jnp.float32)
    scale = jax.nn.sigmoid(s)                        # (Bblk, C)

    # ---- channel-wise rescale (big multiply stays in the input dtype) ----
    o_ref[...] = (x * scale.astype(x.dtype)[:, :, None]).astype(o_ref.dtype)


@jax.jit
def channel_time_sense_se(x, ws, bs, wm, bm, wl, bl, wcat, bcat, w1, b1, w2, b2):
    B, C, T = x.shape
    kmax = max(KERSIZE)
    if T < kmax:
        raise ValueError(f"T={T} must be >= max(kersize)={kmax}")

    # ---- pack the small weights (12 operands -> 7), done once by XLA ----
    wconv = jnp.concatenate([ws, wm, wl], axis=1).T       # (sum(kersize), C)
    bconv = jnp.concatenate([bs, bm, bl], axis=1).T       # (3, C)
    wcat_p = jnp.concatenate([wcat, bcat], axis=1)        # (1, 4)
    w1t = w1.T                                            # (C, Cr)
    w2t = w2.T                                            # (Cr, C)

    # ---- lane-dense time tiles: zero-pad T up to a multiple of 128 ----
    t_pad = -(-T // 128) * 128
    x_p = x if t_pad == T else jnp.pad(x, ((0, 0), (0, 0), (0, t_pad - T)))

    # ---- batch blocking sized for a conservative VMEM budget ----
    # Input + output blocks are double-buffered: ~4 * Bblk * C * Tpad * itemsize,
    # plus the in-kernel f32 working copy.  A 16 MiB block budget (block itself
    # <= 4 MiB) stays well inside the 32 MiB scoped default on all chips.
    row_bytes = C * t_pad * x.dtype.itemsize
    block_budget = 16 * 1024 * 1024
    bblk = int(max(1, min(B, 128, block_budget // (4 * row_bytes))))
    grid_b = -(-B // bblk)
    b_pad = grid_b * bblk
    if b_pad != B:
        x_p = jnp.pad(x_p, ((0, b_pad - B), (0, 0), (0, 0)))

    weights = (wconv, bconv, wcat_p, w1t, b1, w2t, b2)

    def fixed_spec(a):
        nd = a.ndim
        return pl.BlockSpec(a.shape, lambda b, _nd=nd: (0,) * _nd)

    grid_spec = pltpu.PrefetchScalarGridSpec(
        num_scalar_prefetch=0,
        grid=(grid_b,),
        in_specs=[pl.BlockSpec((bblk, C, t_pad), lambda b: (b, 0, 0))]
                 + [fixed_spec(a) for a in weights],
        out_specs=pl.BlockSpec((bblk, C, t_pad), lambda b: (b, 0, 0)),
    )

    kernel = functools.partial(_se_kernel, t_orig=T, kersize=KERSIZE)
    out = pl.pallas_call(
        kernel,
        out_shape=jax.ShapeDtypeStruct((b_pad, C, t_pad), x.dtype),
        grid_spec=grid_spec,
        compiler_params=pltpu.CompilerParams(
            dimension_semantics=("parallel",),
            vmem_limit_bytes=32 * 1024 * 1024),
    )(x_p, *weights)

    # TODO(synk): for C*T too large for a full-(C,T) block in VMEM, split into a
    # reduction pass (emit (B,C) scale) + a T-tiled elementwise rescale pass.
    return out[:B, :, :T]


def ref_forward(x, ws, bs, wm, bm, wl, bl, wcat, bcat, w1, b1, w2, b2):
    """Pure-JAX reference matching the PyTorch forward."""
    B, C, T = x.shape

    def branch(w, b):
        out = jax.lax.conv_general_dilated(
            x, w[:, None, :], window_strides=(1,), padding="VALID",
            dimension_numbers=("NCH", "OIH", "NCH"), feature_group_count=C)
        out = out + b[None, :, :]
        return jnp.maximum(jnp.mean(out, axis=2), 0.0)   # (B, C)

    small, middle, large = branch(ws, bs), branch(wm, bm), branch(wl, bl)
    feature = jnp.stack([small, middle, large], axis=2)  # (B, C, 3)
    squeeze = jnp.einsum("bcf,of->bc", feature, wcat) + bcat[0, 0]
    h = jnp.maximum(squeeze @ w1.T + b1, 0.0)
    s = jax.nn.sigmoid(h @ w2.T + b2)
    return x * s[:, :, None]


if __name__ == "__main__":
    B, C, T = 2, 16, 32
    reduction_ratio = 2
    Cr = C // reduction_ratio

    key = jax.random.PRNGKey(0)
    keys = jax.random.split(key, 13)

    def u(k, shape, fan_in):
        bound = 1.0 / math.sqrt(fan_in)
        return jax.random.uniform(k, shape, jnp.float32, -bound, bound)

    # Deterministic synthetic parameters (PyTorch-like uniform init).
    ws = u(keys[0], (C, KERSIZE[0]), KERSIZE[0]); bs = u(keys[1], (C, 1), KERSIZE[0])
    wm = u(keys[2], (C, KERSIZE[1]), KERSIZE[1]); bm = u(keys[3], (C, 1), KERSIZE[1])
    wl = u(keys[4], (C, KERSIZE[2]), KERSIZE[2]); bl = u(keys[5], (C, 1), KERSIZE[2])
    wcat = u(keys[6], (1, 3), 3);                 bcat = u(keys[7], (1, 1), 3)
    w1 = u(keys[8], (Cr, C), C);                  b1 = u(keys[9], (1, Cr), C)
    w2 = u(keys[10], (C, Cr), Cr);                b2 = u(keys[11], (1, C), Cr)

    x = jax.random.normal(keys[12], (B, C, T), jnp.float32)

    out = channel_time_sense_se(x, ws, bs, wm, bm, wl, bl,
                                wcat, bcat, w1, b1, w2, b2)
    out = jax.block_until_ready(out)

    ref = ref_forward(x, ws, bs, wm, bm, wl, bl, wcat, bcat, w1, b1, w2, b2)
    assert out.shape == (B, C, T)
    assert jnp.allclose(out, ref, atol=2e-5, rtol=2e-5), "mismatch vs reference"

    print("KERNEL_OK")
</pallas_src>

<mosaic_0001>
module attributes {stable_mosaic.version = 11 : i64} {
  func.func @_se_kernel(%arg0: i32, %arg1: memref<2x16x128xf32, #tpu.memory_space<vmem>>, %arg2: memref<18x16xf32, #tpu.memory_space<vmem>>, %arg3: memref<3x16xf32, #tpu.memory_space<vmem>>, %arg4: memref<1x4xf32, #tpu.memory_space<vmem>>, %arg5: memref<16x8xf32, #tpu.memory_space<vmem>>, %arg6: memref<1x8xf32, #tpu.memory_space<vmem>>, %arg7: memref<8x16xf32, #tpu.memory_space<vmem>>, %arg8: memref<1x16xf32, #tpu.memory_space<vmem>>, %arg9: memref<2x16x128xf32, #tpu.memory_space<vmem>>) attributes {dimension_semantics = [#tpu.dimension_semantics<parallel>], iteration_bounds = array<i64: 1>, scalar_prefetch = 0 : i64, scratch_operands = 0 : i64, tpu.core_type = #tpu.core_type<tc>, window_params = [{transform_indices = @transform_0, window_bounds = array<i64: 2, 16, 128>}, {pipeline_mode = #tpu.pipeline_mode<synchronous>, transform_indices = @transform_1, window_bounds = array<i64: 18, 16>}, {pipeline_mode = #tpu.pipeline_mode<synchronous>, transform_indices = @transform_2, window_bounds = array<i64: 3, 16>}, {pipeline_mode = #tpu.pipeline_mode<synchronous>, transform_indices = @transform_3, window_bounds = array<i64: 1, 4>}, {pipeline_mode = #tpu.pipeline_mode<synchronous>, transform_indices = @transform_4, window_bounds = array<i64: 16, 8>}, {pipeline_mode = #tpu.pipeline_mode<synchronous>, transform_indices = @transform_5, window_bounds = array<i64: 1, 8>}, {pipeline_mode = #tpu.pipeline_mode<synchronous>, transform_indices = @transform_6, window_bounds = array<i64: 8, 16>}, {pipeline_mode = #tpu.pipeline_mode<synchronous>, transform_indices = @transform_7, window_bounds = array<i64: 1, 16>}, {transform_indices = @transform_8, window_bounds = array<i64: 2, 16, 128>}]} {
    %c0 = arith.constant 0 : index
    %c0_0 = arith.constant 0 : index
    %c0_1 = arith.constant 0 : index
    %0 = vector.load %arg1[%c0, %c0_0, %c0_1] : memref<2x16x128xf32, #tpu.memory_space<vmem>>, vector<2x16x128xf32>
    %cst = arith.constant dense<0.000000e+00> : vector<2x16xf32>
    %1 = vector.multi_reduction <add>, %0, %cst [2] : vector<2x16x128xf32> to vector<2x16xf32>
    %cst_2 = arith.constant 0.000000e+00 : f32
    %2 = vector.broadcast %cst_2 : f32 to vector<2x16xf32>
    %3 = vector.extract_strided_slice %0 {offsets = [0, 0, 0], sizes = [2, 16, 1], strides = [1, 1, 1]} : vector<2x16x128xf32> to vector<2x16x1xf32>
    %4 = vector.shape_cast %3 : vector<2x16x1xf32> to vector<2x16xf32>
    %5 = arith.addf %2, %4 : vector<2x16xf32>
    %6 = vector.extract_strided_slice %0 {offsets = [0, 0, 1], sizes = [2, 16, 1], strides = [1, 1, 1]} : vector<2x16x128xf32> to vector<2x16x1xf32>
    %7 = vector.shape_cast %6 : vector<2x16x1xf32> to vector<2x16xf32>
    %8 = arith.addf %5, %7 : vector<2x16xf32>
    %9 = vector.extract_strided_slice %0 {offsets = [0, 0, 2], sizes = [2, 16, 1], strides = [1, 1, 1]} : vector<2x16x128xf32> to vector<2x16x1xf32>
    %10 = vector.shape_cast %9 : vector<2x16x1xf32> to vector<2x16xf32>
    %11 = arith.addf %8, %10 : vector<2x16xf32>
    %12 = vector.extract_strided_slice %0 {offsets = [0, 0, 3], sizes = [2, 16, 1], strides = [1, 1, 1]} : vector<2x16x128xf32> to vector<2x16x1xf32>
    %13 = vector.shape_cast %12 : vector<2x16x1xf32> to vector<2x16xf32>
    %14 = arith.addf %11, %13 : vector<2x16xf32>
    %15 = vector.extract_strided_slice %0 {offsets = [0, 0, 4], sizes = [2, 16, 1], strides = [1, 1, 1]} : vector<2x16x128xf32> to vector<2x16x1xf32>
    %16 = vector.shape_cast %15 : vector<2x16x1xf32> to vector<2x16xf32>
    %17 = arith.addf %14, %16 : vector<2x16xf32>
    %18 = vector.extract_strided_slice %0 {offsets = [0, 0, 5], sizes = [2, 16, 1], strides = [1, 1, 1]} : vector<2x16x128xf32> to vector<2x16x1xf32>
    %19 = vector.shape_cast %18 : vector<2x16x1xf32> to vector<2x16xf32>
    %20 = arith.addf %17, %19 : vector<2x16xf32>
    %21 = vector.extract_strided_slice %0 {offsets = [0, 0, 6], sizes = [2, 16, 1], strides = [1, 1, 1]} : vector<2x16x128xf32> to vector<2x16x1xf32>
    %22 = vector.shape_cast %21 : vector<2x16x1xf32> to vector<2x16xf32>
    %23 = arith.addf %20, %22 : vector<2x16xf32>
    %24 = vector.extract_strided_slice %0 {offsets = [0, 0, 7], sizes = [2, 16, 1], strides = [1, 1, 1]} : vector<2x16x128xf32> to vector<2x16x1xf32>
    %25 = vector.shape_cast %24 : vector<2x16x1xf32> to vector<2x16xf32>
    %26 = arith.addf %23, %25 : vector<2x16xf32>
    %27 = vector.extract_strided_slice %0 {offsets = [0, 0, 8], sizes = [2, 16, 1], strides = [1, 1, 1]} : vector<2x16x128xf32> to vector<2x16x1xf32>
    %28 = vector.shape_cast %27 : vector<2x16x1xf32> to vector<2x16xf32>
    %29 = arith.addf %26, %28 : vector<2x16xf32>
    %30 = vector.extract_strided_slice %0 {offsets = [0, 0, 31], sizes = [2, 16, 1], strides = [1, 1, 1]} : vector<2x16x128xf32> to vector<2x16x1xf32>
    %31 = vector.shape_cast %30 : vector<2x16x1xf32> to vector<2x16xf32>
    %32 = arith.addf %2, %31 : vector<2x16xf32>
    %33 = vector.extract_strided_slice %0 {offsets = [0, 0, 30], sizes = [2, 16, 1], strides = [1, 1, 1]} : vector<2x16x128xf32> to vector<2x16x1xf32>
    %34 = vector.shape_cast %33 : vector<2x16x1xf32> to vector<2x16xf32>
    %35 = arith.addf %32, %34 : vector<2x16xf32>
    %36 = vector.extract_strided_slice %0 {offsets = [0, 0, 29], sizes = [2, 16, 1], strides = [1, 1, 1]} : vector<2x16x128xf32> to vector<2x16x1xf32>
    %37 = vector.shape_cast %36 : vector<2x16x1xf32> to vector<2x16xf32>
    %38 = arith.addf %35, %37 : vector<2x16xf32>
    %39 = vector.extract_strided_slice %0 {offsets = [0, 0, 28], sizes = [2, 16, 1], strides = [1, 1, 1]} : vector<2x16x128xf32> to vector<2x16x1xf32>
    %40 = vector.shape_cast %39 : vector<2x16x1xf32> to vector<2x16xf32>
    %41 = arith.addf %38, %40 : vector<2x16xf32>
    %42 = vector.extract_strided_slice %0 {offsets = [0, 0, 27], sizes = [2, 16, 1], strides = [1, 1, 1]} : vector<2x16x128xf32> to vector<2x16x1xf32>
    %43 = vector.shape_cast %42 : vector<2x16x1xf32> to vector<2x16xf32>
    %44 = arith.addf %41, %43 : vector<2x16xf32>
    %45 = vector.extract_strided_slice %0 {offsets = [0, 0, 26], sizes = [2, 16, 1], strides = [1, 1, 1]} : vector<2x16x128xf32> to vector<2x16x1xf32>
    %46 = vector.shape_cast %45 : vector<2x16x1xf32> to vector<2x16xf32>
    %47 = arith.addf %44, %46 : vector<2x16xf32>
    %48 = vector.extract_strided_slice %0 {offsets = [0, 0, 25], sizes = [2, 16, 1], strides = [1, 1, 1]} : vector<2x16x128xf32> to vector<2x16x1xf32>
    %49 = vector.shape_cast %48 : vector<2x16x1xf32> to vector<2x16xf32>
    %50 = arith.addf %47, %49 : vector<2x16xf32>
    %51 = vector.extract_strided_slice %0 {offsets = [0, 0, 24], sizes = [2, 16, 1], strides = [1, 1, 1]} : vector<2x16x128xf32> to vector<2x16x1xf32>
    %52 = vector.shape_cast %51 : vector<2x16x1xf32> to vector<2x16xf32>
    %53 = arith.addf %50, %52 : vector<2x16xf32>
    %54 = vector.extract_strided_slice %0 {offsets = [0, 0, 23], sizes = [2, 16, 1], strides = [1, 1, 1]} : vector<2x16x128xf32> to vector<2x16x1xf32>
    %55 = vector.shape_cast %54 : vector<2x16x1xf32> to vector<2x16xf32>
    %56 = arith.addf %53, %55 : vector<2x16xf32>
    %c0_3 = arith.constant 0 : index
    %c0_4 = arith.constant 0 : index
    %57 = vector.load %arg2[%c0_3, %c0_4] : memref<18x16xf32, #tpu.memory_space<vmem>>, vector<18x16xf32>
    %c0_5 = arith.constant 0 : index
    %c0_6 = arith.constant 0 : index
    %58 = vector.load %arg3[%c0_5, %c0_6] : memref<3x16xf32, #tpu.memory_space<vmem>>, vector<3x16xf32>
    %59 = arith.subf %1, %2 : vector<2x16xf32>
    %60 = arith.subf %59, %35 : vector<2x16xf32>
    %61 = vector.extract_strided_slice %57 {offsets = [0, 0], sizes = [1, 16], strides = [1, 1]} : vector<18x16xf32> to vector<1x16xf32>
    %62 = vector.shape_cast %61 : vector<1x16xf32> to vector<16xf32>
    %63 = vector.shape_cast %62 : vector<16xf32> to vector<1x16xf32>
    %64 = vector.broadcast %63 : vector<1x16xf32> to vector<2x16xf32>
    %65 = arith.mulf %64, %60 : vector<2x16xf32>
    %66 = arith.addf %2, %65 : vector<2x16xf32>
    %67 = arith.subf %1, %5 : vector<2x16xf32>
    %68 = arith.subf %67, %32 : vector<2x16xf32>
    %69 = vector.extract_strided_slice %57 {offsets = [1, 0], sizes = [1, 16], strides = [1, 1]} : vector<18x16xf32> to vector<1x16xf32>
    %70 = vector.shape_cast %69 : vector<1x16xf32> to vector<16xf32>
    %71 = vector.shape_cast %70 : vector<16xf32> to vector<1x16xf32>
    %72 = vector.broadcast %71 : vector<1x16xf32> to vector<2x16xf32>
    %73 = arith.mulf %72, %68 : vector<2x16xf32>
    %74 = arith.addf %66, %73 : vector<2x16xf32>
    %75 = arith.subf %1, %8 : vector<2x16xf32>
    %76 = arith.subf %75, %2 : vector<2x16xf32>
    %77 = vector.extract_strided_slice %57 {offsets = [2, 0], sizes = [1, 16], strides = [1, 1]} : vector<18x16xf32> to vector<1x16xf32>
    %78 = vector.shape_cast %77 : vector<1x16xf32> to vector<16xf32>
    %79 = vector.shape_cast %78 : vector<16xf32> to vector<1x16xf32>
    %80 = vector.broadcast %79 : vector<1x16xf32> to vector<2x16xf32>
    %81 = arith.mulf %80, %76 : vector<2x16xf32>
    %82 = arith.addf %74, %81 : vector<2x16xf32>
    %cst_7 = arith.constant 0.0333333351 : f32
    %83 = vector.broadcast %cst_7 : f32 to vector<2x16xf32>
    %84 = arith.mulf %82, %83 : vector<2x16xf32>
    %85 = vector.extract_strided_slice %58 {offsets = [0, 0], sizes = [1, 16], strides = [1, 1]} : vector<3x16xf32> to vector<1x16xf32>
    %86 = vector.shape_cast %85 : vector<1x16xf32> to vector<16xf32>
    %87 = vector.shape_cast %86 : vector<16xf32> to vector<1x16xf32>
    %88 = vector.broadcast %87 : vector<1x16xf32> to vector<2x16xf32>
    %89 = arith.addf %84, %88 : vector<2x16xf32>
    %cst_8 = arith.constant 0.000000e+00 : f32
    %90 = vector.broadcast %cst_8 : f32 to vector<2x16xf32>
    %91 = arith.maximumf %89, %90 : vector<2x16xf32>
    %92 = arith.subf %1, %2 : vector<2x16xf32>
    %93 = arith.subf %92, %41 : vector<2x16xf32>
    %94 = vector.extract_strided_slice %57 {offsets = [3, 0], sizes = [1, 16], strides = [1, 1]} : vector<18x16xf32> to vector<1x16xf32>
    %95 = vector.shape_cast %94 : vector<1x16xf32> to vector<16xf32>
    %96 = vector.shape_cast %95 : vector<16xf32> to vector<1x16xf32>
    %97 = vector.broadcast %96 : vector<1x16xf32> to vector<2x16xf32>
    %98 = arith.mulf %97, %93 : vector<2x16xf32>
    %99 = arith.addf %2, %98 : vector<2x16xf32>
    %100 = arith.subf %1, %5 : vector<2x16xf32>
    %101 = arith.subf %100, %38 : vector<2x16xf32>
    %102 = vector.extract_strided_slice %57 {offsets = [4, 0], sizes = [1, 16], strides = [1, 1]} : vector<18x16xf32> to vector<1x16xf32>
    %103 = vector.shape_cast %102 : vector<1x16xf32> to vector<16xf32>
    %104 = vector.shape_cast %103 : vector<16xf32> to vector<1x16xf32>
    %105 = vector.broadcast %104 : vector<1x16xf32> to vector<2x16xf32>
    %106 = arith.mulf %105, %101 : vector<2x16xf32>
    %107 = arith.addf %99, %106 : vector<2x16xf32>
    %108 = arith.subf %1, %8 : vector<2x16xf32>
    %109 = arith.subf %108, %35 : vector<2x16xf32>
    %110 = vector.extract_strided_slice %57 {offsets = [5, 0], sizes = [1, 16], strides = [1, 1]} : vector<18x16xf32> to vector<1x16xf32>
    %111 = vector.shape_cast %110 : vector<1x16xf32> to vector<16xf32>
    %112 = vector.shape_cast %111 : vector<16xf32> to vector<1x16xf32>
    %113 = vector.broadcast %112 : vector<1x16xf32> to vector<2x16xf32>
    %114 = arith.mulf %113, %109 : vector<2x16xf32>
    %115 = arith.addf %107, %114 : vector<2x16xf32>
    %116 = arith.subf %1, %11 : vector<2x16xf32>
    %117 = arith.subf %116, %32 : vector<2x16xf32>
    %118 = vector.extract_strided_slice %57 {offsets = [6, 0], sizes = [1, 16], strides = [1, 1]} : vector<18x16xf32> to vector<1x16xf32>
    %119 = vector.shape_cast %118 : vector<1x16xf32> to vector<16xf32>
    %120 = vector.shape_cast %119 : vector<16xf32> to vector<1x16xf32>
    %121 = vector.broadcast %120 : vector<1x16xf32> to vector<2x16xf32>
    %122 = arith.mulf %121, %117 : vector<2x16xf32>
    %123 = arith.addf %115, %122 : vector<2x16xf32>
    %124 = arith.subf %1, %14 : vector<2x16xf32>
    %125 = arith.subf %124, %2 : vector<2x16xf32>
    %126 = vector.extract_strided_slice %57 {offsets = [7, 0], sizes = [1, 16], strides = [1, 1]} : vector<18x16xf32> to vector<1x16xf32>
    %127 = vector.shape_cast %126 : vector<1x16xf32> to vector<16xf32>
    %128 = vector.shape_cast %127 : vector<16xf32> to vector<1x16xf32>
    %129 = vector.broadcast %128 : vector<1x16xf32> to vector<2x16xf32>
    %130 = arith.mulf %129, %125 : vector<2x16xf32>
    %131 = arith.addf %123, %130 : vector<2x16xf32>
    %cst_9 = arith.constant 0.0357142873 : f32
    %132 = vector.broadcast %cst_9 : f32 to vector<2x16xf32>
    %133 = arith.mulf %131, %132 : vector<2x16xf32>
    %134 = vector.extract_strided_slice %58 {offsets = [1, 0], sizes = [1, 16], strides = [1, 1]} : vector<3x16xf32> to vector<1x16xf32>
    %135 = vector.shape_cast %134 : vector<1x16xf32> to vector<16xf32>
    %136 = vector.shape_cast %135 : vector<16xf32> to vector<1x16xf32>
    %137 = vector.broadcast %136 : vector<1x16xf32> to vector<2x16xf32>
    %138 = arith.addf %133, %137 : vector<2x16xf32>
    %cst_10 = arith.constant 0.000000e+00 : f32
    %139 = vector.broadcast %cst_10 : f32 to vector<2x16xf32>
    %140 = arith.maximumf %138, %139 : vector<2x16xf32>
    %141 = arith.subf %1, %2 : vector<2x16xf32>
    %142 = arith.subf %141, %56 : vector<2x16xf32>
    %143 = vector.extract_strided_slice %57 {offsets = [8, 0], sizes = [1, 16], strides = [1, 1]} : vector<18x16xf32> to vector<1x16xf32>
    %144 = vector.shape_cast %143 : vector<1x16xf32> to vector<16xf32>
    %145 = vector.shape_cast %144 : vector<16xf32> to vector<1x16xf32>
    %146 = vector.broadcast %145 : vector<1x16xf32> to vector<2x16xf32>
    %147 = arith.mulf %146, %142 : vector<2x16xf32>
    %148 = arith.addf %2, %147 : vector<2x16xf32>
    %149 = arith.subf %1, %5 : vector<2x16xf32>
    %150 = arith.subf %149, %53 : vector<2x16xf32>
    %151 = vector.extract_strided_slice %57 {offsets = [9, 0], sizes = [1, 16], strides = [1, 1]} : vector<18x16xf32> to vector<1x16xf32>
    %152 = vector.shape_cast %151 : vector<1x16xf32> to vector<16xf32>
    %153 = vector.shape_cast %152 : vector<16xf32> to vector<1x16xf32>
    %154 = vector.broadcast %153 : vector<1x16xf32> to vector<2x16xf32>
    %155 = arith.mulf %154, %150 : vector<2x16xf32>
    %156 = arith.addf %148, %155 : vector<2x16xf32>
    %157 = arith.subf %1, %8 : vector<2x16xf32>
    %158 = arith.subf %157, %50 : vector<2x16xf32>
    %159 = vector.extract_strided_slice %57 {offsets = [10, 0], sizes = [1, 16], strides = [1, 1]} : vector<18x16xf32> to vector<1x16xf32>
    %160 = vector.shape_cast %159 : vector<1x16xf32> to vector<16xf32>
    %161 = vector.shape_cast %160 : vector<16xf32> to vector<1x16xf32>
    %162 = vector.broadcast %161 : vector<1x16xf32> to vector<2x16xf32>
    %163 = arith.mulf %162, %158 : vector<2x16xf32>
    %164 = arith.addf %156, %163 : vector<2x16xf32>
    %165 = arith.subf %1, %11 : vector<2x16xf32>
    %166 = arith.subf %165, %47 : vector<2x16xf32>
    %167 = vector.extract_strided_slice %57 {offsets = [11, 0], sizes = [1, 16], strides = [1, 1]} : vector<18x16xf32> to vector<1x16xf32>
    %168 = vector.shape_cast %167 : vector<1x16xf32> to vector<16xf32>
    %169 = vector.shape_cast %168 : vector<16xf32> to vector<1x16xf32>
    %170 = vector.broadcast %169 : vector<1x16xf32> to vector<2x16xf32>
    %171 = arith.mulf %170, %166 : vector<2x16xf32>
    %172 = arith.addf %164, %171 : vector<2x16xf32>
    %173 = arith.subf %1, %14 : vector<2x16xf32>
    %174 = arith.subf %173, %44 : vector<2x16xf32>
    %175 = vector.extract_strided_slice %57 {offsets = [12, 0], sizes = [1, 16], strides = [1, 1]} : vector<18x16xf32> to vector<1x16xf32>
    %176 = vector.shape_cast %175 : vector<1x16xf32> to vector<16xf32>
    %177 = vector.shape_cast %176 : vector<16xf32> to vector<1x16xf32>
    %178 = vector.broadcast %177 : vector<1x16xf32> to vector<2x16xf32>
    %179 = arith.mulf %178, %174 : vector<2x16xf32>
    %180 = arith.addf %172, %179 : vector<2x16xf32>
    %181 = arith.subf %1, %17 : vector<2x16xf32>
    %182 = arith.subf %181, %41 : vector<2x16xf32>
    %183 = vector.extract_strided_slice %57 {offsets = [13, 0], sizes = [1, 16], strides = [1, 1]} : vector<18x16xf32> to vector<1x16xf32>
    %184 = vector.shape_cast %183 : vector<1x16xf32> to vector<16xf32>
    %185 = vector.shape_cast %184 : vector<16xf32> to vector<1x16xf32>
    %186 = vector.broadcast %185 : vector<1x16xf32> to vector<2x16xf32>
    %187 = arith.mulf %186, %182 : vector<2x16xf32>
    %188 = arith.addf %180, %187 : vector<2x16xf32>
    %189 = arith.subf %1, %20 : vector<2x16xf32>
    %190 = arith.subf %189, %38 : vector<2x16xf32>
    %191 = vector.extract_strided_slice %57 {offsets = [14, 0], sizes = [1, 16], strides = [1, 1]} : vector<18x16xf32> to vector<1x16xf32>
    %192 = vector.shape_cast %191 : vector<1x16xf32> to vector<16xf32>
    %193 = vector.shape_cast %192 : vector<16xf32> to vector<1x16xf32>
    %194 = vector.broadcast %193 : vector<1x16xf32> to vector<2x16xf32>
    %195 = arith.mulf %194, %190 : vector<2x16xf32>
    %196 = arith.addf %188, %195 : vector<2x16xf32>
    %197 = arith.subf %1, %23 : vector<2x16xf32>
    %198 = arith.subf %197, %35 : vector<2x16xf32>
    %199 = vector.extract_strided_slice %57 {offsets = [15, 0], sizes = [1, 16], strides = [1, 1]} : vector<18x16xf32> to vector<1x16xf32>
    %200 = vector.shape_cast %199 : vector<1x16xf32> to vector<16xf32>
    %201 = vector.shape_cast %200 : vector<16xf32> to vector<1x16xf32>
    %202 = vector.broadcast %201 : vector<1x16xf32> to vector<2x16xf32>
    %203 = arith.mulf %202, %198 : vector<2x16xf32>
    %204 = arith.addf %196, %203 : vector<2x16xf32>
    %205 = arith.subf %1, %26 : vector<2x16xf32>
    %206 = arith.subf %205, %32 : vector<2x16xf32>
    %207 = vector.extract_strided_slice %57 {offsets = [16, 0], sizes = [1, 16], strides = [1, 1]} : vector<18x16xf32> to vector<1x16xf32>
    %208 = vector.shape_cast %207 : vector<1x16xf32> to vector<16xf32>
    %209 = vector.shape_cast %208 : vector<16xf32> to vector<1x16xf32>
    %210 = vector.broadcast %209 : vector<1x16xf32> to vector<2x16xf32>
    %211 = arith.mulf %210, %206 : vector<2x16xf32>
    %212 = arith.addf %204, %211 : vector<2x16xf32>
    %213 = arith.subf %1, %29 : vector<2x16xf32>
    %214 = arith.subf %213, %2 : vector<2x16xf32>
    %215 = vector.extract_strided_slice %57 {offsets = [17, 0], sizes = [1, 16], strides = [1, 1]} : vector<18x16xf32> to vector<1x16xf32>
    %216 = vector.shape_cast %215 : vector<1x16xf32> to vector<16xf32>
    %217 = vector.shape_cast %216 : vector<16xf32> to vector<1x16xf32>
    %218 = vector.broadcast %217 : vector<1x16xf32> to vector<2x16xf32>
    %219 = arith.mulf %218, %214 : vector<2x16xf32>
    %220 = arith.addf %212, %219 : vector<2x16xf32>
    %cst_11 = arith.constant 0.0434782617 : f32
    %221 = vector.broadcast %cst_11 : f32 to vector<2x16xf32>
    %222 = arith.mulf %220, %221 : vector<2x16xf32>
    %223 = vector.extract_strided_slice %58 {offsets = [2, 0], sizes = [1, 16], strides = [1, 1]} : vector<3x16xf32> to vector<1x16xf32>
    %224 = vector.shape_cast %223 : vector<1x16xf32> to vector<16xf32>
    %225 = vector.shape_cast %224 : vector<16xf32> to vector<1x16xf32>
    %226 = vector.broadcast %225 : vector<1x16xf32> to vector<2x16xf32>
    %227 = arith.addf %222, %226 : vector<2x16xf32>
    %cst_12 = arith.constant 0.000000e+00 : f32
    %228 = vector.broadcast %cst_12 : f32 to vector<2x16xf32>
    %229 = arith.maximumf %227, %228 : vector<2x16xf32>
    %c0_13 = arith.constant 0 : index
    %c0_14 = arith.constant 0 : index
    %230 = vector.load %arg4[%c0_13, %c0_14] : memref<1x4xf32, #tpu.memory_space<vmem>>, vector<1x4xf32>
    %231 = vector.extract_strided_slice %230 {offsets = [0, 0], sizes = [1, 1], strides = [1, 1]} : vector<1x4xf32> to vector<1x1xf32>
    %232 = vector.broadcast %231 : vector<1x1xf32> to vector<2x16xf32>
    %233 = arith.mulf %91, %232 : vector<2x16xf32>
    %234 = vector.extract_strided_slice %230 {offsets = [0, 1], sizes = [1, 1], strides = [1, 1]} : vector<1x4xf32> to vector<1x1xf32>
    %235 = vector.broadcast %234 : vector<1x1xf32> to vector<2x16xf32>
    %236 = arith.mulf %140, %235 : vector<2x16xf32>
    %237 = arith.addf %233, %236 : vector<2x16xf32>
    %238 = vector.extract_strided_slice %230 {offsets = [0, 2], sizes = [1, 1], strides = [1, 1]} : vector<1x4xf32> to vector<1x1xf32>
    %239 = vector.broadcast %238 : vector<1x1xf32> to vector<2x16xf32>
    %240 = arith.mulf %229, %239 : vector<2x16xf32>
    %241 = arith.addf %237, %240 : vector<2x16xf32>
    %242 = vector.extract_strided_slice %230 {offsets = [0, 3], sizes = [1, 1], strides = [1, 1]} : vector<1x4xf32> to vector<1x1xf32>
    %243 = vector.broadcast %242 : vector<1x1xf32> to vector<2x16xf32>
    %244 = arith.addf %241, %243 : vector<2x16xf32>
    %c0_15 = arith.constant 0 : index
    %c0_16 = arith.constant 0 : index
    %245 = vector.load %arg5[%c0_15, %c0_16] : memref<16x8xf32, #tpu.memory_space<vmem>>, vector<16x8xf32>
    %cst_17 = arith.constant dense<0.000000e+00> : vector<2x8xf32>
    %246 = tpu.matmul %244, %245, %cst_17 {dimension_numbers = #tpu.dot_dimension_numbers<[1], [0], [0], [1], [0, 0, 1, 1], [], []>} : vector<2x16xf32>, vector<16x8xf32>, vector<2x8xf32> -> vector<2x8xf32>
    %c0_18 = arith.constant 0 : index
    %c0_19 = arith.constant 0 : index
    %247 = vector.load %arg6[%c0_18, %c0_19] : memref<1x8xf32, #tpu.memory_space<vmem>>, vector<1x8xf32>
    %248 = vector.broadcast %247 : vector<1x8xf32> to vector<2x8xf32>
    %249 = arith.addf %246, %248 : vector<2x8xf32>
    %cst_20 = arith.constant 0.000000e+00 : f32
    %250 = vector.broadcast %cst_20 : f32 to vector<2x8xf32>
    %251 = arith.maximumf %249, %250 : vector<2x8xf32>
    %c0_21 = arith.constant 0 : index
    %c0_22 = arith.constant 0 : index
    %252 = vector.load %arg7[%c0_21, %c0_22] : memref<8x16xf32, #tpu.memory_space<vmem>>, vector<8x16xf32>
    %cst_23 = arith.constant dense<0.000000e+00> : vector<2x16xf32>
    %253 = tpu.matmul %251, %252, %cst_23 {dimension_numbers = #tpu.dot_dimension_numbers<[1], [0], [0], [1], [0, 0, 1, 1], [], []>} : vector<2x8xf32>, vector<8x16xf32>, vector<2x16xf32> -> vector<2x16xf32>
    %c0_24 = arith.constant 0 : index
    %c0_25 = arith.constant 0 : index
    %254 = vector.load %arg8[%c0_24, %c0_25] : memref<1x16xf32, #tpu.memory_space<vmem>>, vector<1x16xf32>
    %255 = vector.broadcast %254 : vector<1x16xf32> to vector<2x16xf32>
    %256 = arith.addf %253, %255 : vector<2x16xf32>
    %257 = arith.negf %256 : vector<2x16xf32>
    %258 = math.exp %257 : vector<2x16xf32>
    %cst_26 = arith.constant 1.000000e+00 : f32
    %259 = vector.broadcast %cst_26 : f32 to vector<2x16xf32>
    %260 = arith.addf %259, %258 : vector<2x16xf32>
    %261 = arith.divf %259, %260 : vector<2x16xf32>
    %262 = vector.shape_cast %261 : vector<2x16xf32> to vector<2x16x1xf32>
    %263 = vector.broadcast %262 : vector<2x16x1xf32> to vector<2x16x128xf32>
    %264 = arith.mulf %0, %263 : vector<2x16x128xf32>
    %c0_27 = arith.constant 0 : index
    %c0_28 = arith.constant 0 : index
    %c0_29 = arith.constant 0 : index
    %265 = vector.load %arg9[%c0_27, %c0_28, %c0_29] : memref<2x16x128xf32, #tpu.memory_space<vmem>>, vector<2x16x128xf32>
    tpu.vector_store %arg9[%c0_27, %c0_28, %c0_29], %264 {strides = array<i32>} : memref<2x16x128xf32, #tpu.memory_space<vmem>>, vector<2x16x128xf32>,
    return
  }
  func.func @transform_0(%arg0: i32) -> (i32, i32, i32) {
    %c0_i32 = arith.constant 0 : i32
    %c0_i32_0 = arith.constant 0 : i32
    %c0_i32_1 = arith.constant 0 : i32
    return %arg0, %c0_i32, %c0_i32_0 : i32, i32, i32
  }
  func.func @transform_1(%arg0: i32) -> (i32, i32) {
    %c0_i32 = arith.constant 0 : i32
    %c0_i32_0 = arith.constant 0 : i32
    %c0_i32_1 = arith.constant 0 : i32
    return %c0_i32, %c0_i32_0 : i32, i32
  }
  func.func @transform_2(%arg0: i32) -> (i32, i32) {
    %c0_i32 = arith.constant 0 : i32
    %c0_i32_0 = arith.constant 0 : i32
    %c0_i32_1 = arith.constant 0 : i32
    return %c0_i32, %c0_i32_0 : i32, i32
  }
  func.func @transform_3(%arg0: i32) -> (i32, i32) {
    %c0_i32 = arith.constant 0 : i32
    %c0_i32_0 = arith.constant 0 : i32
    %c0_i32_1 = arith.constant 0 : i32
    return %c0_i32, %c0_i32_0 : i32, i32
  }
  func.func @transform_4(%arg0: i32) -> (i32, i32) {
    %c0_i32 = arith.constant 0 : i32
    %c0_i32_0 = arith.constant 0 : i32
    %c0_i32_1 = arith.constant 0 : i32
    return %c0_i32, %c0_i32_0 : i32, i32
  }
  func.func @transform_5(%arg0: i32) -> (i32, i32) {
    %c0_i32 = arith.constant 0 : i32
    %c0_i32_0 = arith.constant 0 : i32
    %c0_i32_1 = arith.constant 0 : i32
    return %c0_i32, %c0_i32_0 : i32, i32
  }
  func.func @transform_6(%arg0: i32) -> (i32, i32) {
    %c0_i32 = arith.constant 0 : i32
    %c0_i32_0 = arith.constant 0 : i32
    %c0_i32_1 = arith.constant 0 : i32
    return %c0_i32, %c0_i32_0 : i32, i32
  }
  func.func @transform_7(%arg0: i32) -> (i32, i32) {
    %c0_i32 = arith.constant 0 : i32
    %c0_i32_0 = arith.constant 0 : i32
    %c0_i32_1 = arith.constant 0 : i32
    return %c0_i32, %c0_i32_0 : i32, i32
  }
  func.func @transform_8(%arg0: i32) -> (i32, i32, i32) {
    %c0_i32 = arith.constant 0 : i32
    %c0_i32_0 = arith.constant 0 : i32
    %c0_i32_1 = arith.constant 0 : i32
    return %arg0, %c0_i32, %c0_i32_0 : i32, i32, i32
  }
}

</mosaic_0001>

<bundles_post_ra>
// kernel: channel_time_sense_se.1
= control target key start
LH: loop header
LB: loop body
LE: loop exit
PB: predicated region body
PF: predicated region fallthrough
CT: control target
= control target key end

     0   :  { %s1653_s9 = smov 1   ;;  %s2457_s0 = inlined_call_operand.vmem [shape: f32[2,16,128], index: 0, kind: input, shape index: {}]   ;;  %s2458_s1 = inlined_call_operand.vmem [shape: f32[18,16], index: 1, kind: input, shape index: {}]   ;;  %s2459_s2 = inlined_call_operand.vmem [shape: f32[3,16], index: 2, kind: input, shape index: {}]   ;;  %s2460_s3 = inlined_call_operand.vmem [shape: f32[1,4], index: 3, kind: input, shape index: {}]   ;;  %s2461_s4 = inlined_call_operand.vmem [shape: f32[16,8], index: 4, kind: input, shape index: {}]   ;;  %s2462_s5 = inlined_call_operand.vmem [shape: f32[1,8], index: 5, kind: input, shape index: {}]   ;;  %s2463_s6 = inlined_call_operand.vmem [shape: f32[8,16], index: 6, kind: input, shape index: {}]   ;;  %s2464_s7 = inlined_call_operand.vmem [shape: f32[1,16], index: 7, kind: input, shape index: {}]   ;;  %s2465_s8 = inlined_call_operand.hbm [shape: f32[2,16,128], index: 8, kind: output, shape index: {}]  }
   0x1   :  { %v1727_v0 = vld [vmem:[%s2457_s0 + $0x10] sm:$0xff]  ;;  %v1732_v1 = vld [vmem:[%s2457_s0] sm:$0xff] }
   0x2   :  { %182 = vrot.lane.b32.xlu1 %v1727_v0, %s1653_s9  ;;  %178 = vrot.lane.b32.xlu0 %v1732_v1, %s1653_s9 }
   0x3   :  { %13 = vsyncpa [#allocation3], 0  ;;  %v1739_v2 = vld [vmem:[%s2457_s0 + $0x18] sm:$0xff]  ;;  %v1744_v3 = vld [vmem:[%s2457_s0 + $0x8] sm:$0xff]  ;;  %s1654_s14 = smov 2   ;;  %s1655_s15 = smov 3  }
   0x4   :  { %s1656_s16 = smov 4   ;;  %s1657_s17 = smov 5   ;;  %v1663_v22 = vmov 31   ;;  %vm345_vm0 = vcmask 130112   ;;  %vm356_vm1 = vcmask 1041409   ;;  %vm1676_vm2 = vmmov 0  }
   0x5   :  { %s1658_s18 = smov 6   ;;  %s1659_s19 = smov 7   ;;  %1612 = vset.pattern.permute.xlu1 %v1663_v22  ;;  %1611 = vset.pattern.permute.xlu0 %v1663_v22  ;;  %vm1353_vm3 = vcmask 130048   ;;  %vm1436_vm4 = vcmask 64512  }
   0x6   :  { %184 = vrot.lane.b32.xlu1 %v1739_v2, %s1653_s9  ;;  %180 = vrot.lane.b32.xlu0 %v1744_v3, %s1653_s9  ;;  %s1660_s20 = smov 127   ;;  %s1661_s21 = smov 8  }
   0x7   :  { %s1662_s22 = smov 126   ;;  %s1664_s23 = smov 97  }
   0x8   :  { %s1665_s24 = smov 125   ;;  %s1666_s25 = smov 124  }
   0x9   :  { %s1667_s26 = smov 123   ;;  %s1668_s27 = smov 122  }
   0xa   :  { %196 = vrot.lane.b32.xlu1 %v1744_v3, %s1654_s14  ;;  %194 = vrot.lane.b32.xlu0 %v1732_v1, %s1654_s14  ;;  %s1669_s28 = smov 121   ;;  %s1670_s29 = smov 120  }
   0xe   :  { %200 = vrot.lane.b32.xlu1 %v1739_v2, %s1654_s14  ;;  %198 = vrot.lane.b32.xlu0 %v1727_v0, %s1654_s14 }
  0x12   :  { %212 = vrot.lane.b32.xlu1 %v1744_v3, %s1655_s15  ;;  %210 = vrot.lane.b32.xlu0 %v1732_v1, %s1655_s15 }
  0x16   :  { %216 = vrot.lane.b32.xlu1 %v1739_v2, %s1655_s15  ;;  %214 = vrot.lane.b32.xlu0 %v1727_v0, %s1655_s15 }
  0x1a   :  { %228 = vrot.lane.b32.xlu1 %v1744_v3, %s1656_s16  ;;  %226 = vrot.lane.b32.xlu0 %v1732_v1, %s1656_s16 }
  0x1e   :  { %232 = vrot.lane.b32.xlu1 %v1739_v2, %s1656_s16  ;;  %230 = vrot.lane.b32.xlu0 %v1727_v0, %s1656_s16 }
  0x22   :  { %244 = vrot.lane.b32.xlu1 %v1744_v3, %s1657_s17  ;;  %242 = vrot.lane.b32.xlu0 %v1732_v1, %s1657_s17 }
  0x26   :  { %248 = vrot.lane.b32.xlu1 %v1739_v2, %s1657_s17  ;;  %246 = vrot.lane.b32.xlu0 %v1727_v0, %s1657_s17 }
  0x2a   :  { %260 = vrot.lane.b32.xlu1 %v1744_v3, %s1658_s18  ;;  %258 = vrot.lane.b32.xlu0 %v1732_v1, %s1658_s18 }
  0x2e   :  { %264 = vrot.lane.b32.xlu1 %v1739_v2, %s1658_s18  ;;  %262 = vrot.lane.b32.xlu0 %v1727_v0, %s1658_s18 }
  0x32   :  { %276 = vrot.lane.b32.xlu1 %v1744_v3, %s1659_s19  ;;  %274 = vrot.lane.b32.xlu0 %v1732_v1, %s1659_s19 }
  0x36   :  { %280 = vrot.lane.b32.xlu1 %v1739_v2, %s1659_s19  ;;  %278 = vrot.lane.b32.xlu0 %v1727_v0, %s1659_s19 }
  0x55   :  { %34 = vadd.xlane.f32.xlu0 %v1732_v1 }
  0x59   :  { %38 = vadd.xlane.f32.xlu0 %v1727_v0 }
  0x5a   :  { %36 = vadd.xlane.f32.xlu1 %v1744_v3 }
  0x5d   :  { %40 = vadd.xlane.f32.xlu0 %v1739_v2 }
  0x6b   :  { %50 = vrot.lane.b32.xlu1 %v1732_v1, %s1660_s20 }
  0x6f   :  { %54 = vrot.lane.b32.xlu1 %v1727_v0, %s1660_s20 }
  0x73   :  { %52 = vrot.lane.b32.xlu0 %v1744_v3, %s1660_s20  ;;  %56 = vrot.lane.b32.xlu1 %v1739_v2, %s1660_s20 }
  0x74   :  { %v183_v4 = vpop.permute.xlu1 %182  ;;  %v179_v5 = vpop.permute.xlu0 %178 }
  0x75   :  { %v1798_v26 = vadd.f32 %v179_v5, %v1732_v1  ;;  %v1807_v31 = vadd.f32 %v183_v4, %v1727_v0 }
  0x77   :  { %290 = vrot.lane.b32.xlu0 %v1732_v1, %s1661_s21  ;;  %292 = vrot.lane.b32.xlu1 %v1744_v3, %s1661_s21 }
  0x78   :  { %v185_v6 = vpop.permute.xlu1 %184  ;;  %v181_v7 = vpop.permute.xlu0 %180 }
  0x79   :  { %v1795_v23 = vadd.f32 %v181_v7, %v1744_v3  ;;  %v1810_v32 = vadd.f32 %v185_v6, %v1739_v2 }
  0x7b   :  { %294 = vrot.lane.b32.xlu0 %v1727_v0, %s1661_s21  ;;  %296 = vrot.lane.b32.xlu1 %v1739_v2, %s1661_s21 }
  0x7c   :  { %v197_v8 = vpop.permute.xlu1 %196  ;;  %v195_v9 = vpop.permute.xlu0 %194 }
  0x7d   :  { %v1801_v27 = vadd.f32 %v197_v8, %v1795_v23  ;;  %v1804_v28 = vadd.f32 %v195_v9, %v1798_v26 }
  0x7f   :  { %68 = vrot.lane.b32.xlu1 %v1744_v3, %s1662_s22  ;;  %66 = vrot.lane.b32.xlu0 %v1732_v1, %s1662_s22 }
  0x80   :  { %v201_v10 = vpop.permute.xlu1 %200  ;;  %v199_v11 = vpop.permute.xlu0 %198 }
  0x81   :  { %v1819_v35 = vadd.f32 %v201_v10, %v1810_v32  ;;  %v1822_v36 = vadd.f32 %v199_v11, %v1807_v31 }
  0x83   :  { %70 = vrot.lane.b32.xlu0 %v1727_v0, %s1662_s22  ;;  %72 = vrot.lane.b32.xlu1 %v1739_v2, %s1662_s22 }
  0x84   :  { %v213_v12 = vpop.permute.xlu1 %212  ;;  %v211_v13 = vpop.permute.xlu0 %210 }
  0x85   :  { %v1813_v33 = vadd.f32 %v213_v12, %v1801_v27  ;;  %v1816_v34 = vadd.f32 %v211_v13, %v1804_v28 }
  0x88   :  { %v217_v14 = vpop.permute.xlu1 %216  ;;  %v215_v15 = vpop.permute.xlu0 %214 }
  0x89   :  { %v1827_v41 = vadd.f32 %v217_v14, %v1819_v35  ;;  %v1830_v42 = vadd.f32 %v215_v15, %v1822_v36 }
  0x8c   :  { %v229_v16 = vpop.permute.xlu1 %228  ;;  %v227_v17 = vpop.permute.xlu0 %226 }
  0x8d   :  { %v239_v37 = vadd.f32 %v229_v16, %v1813_v33  ;;  %v238_v38 = vadd.f32 %v227_v17, %v1816_v34 }
  0x90   :  { %v233_v18 = vpop.permute.xlu1 %232  ;;  %v231_v19 = vpop.permute.xlu0 %230 }
  0x91   :  { %v241_v45 = vadd.f32 %v233_v18, %v1827_v41  ;;  %v240_v46 = vadd.f32 %v231_v19, %v1830_v42 }
  0x94   :  { %v245_v20 = vpop.permute.xlu1 %244  ;;  %v243_v21 = vpop.permute.xlu0 %242 }
  0x95   :  { %v255_v43 = vadd.f32 %v245_v20, %v239_v37  ;;  %v254_v44 = vadd.f32 %v243_v21, %v238_v38 }
  0x98   :  { %v249_v24 = vpop.permute.xlu1 %248  ;;  %v247_v25 = vpop.permute.xlu0 %246 }
  0x99   :  { %v257_v51 = vadd.f32 %v249_v24, %v241_v45  ;;  %v256_v52 = vadd.f32 %v247_v25, %v240_v46 }
  0x9c   :  { %v261_v29 = vpop.permute.xlu1 %260  ;;  %v259_v30 = vpop.permute.xlu0 %258 }
  0x9d   :  { %v271_v47 = vadd.f32 %v261_v29, %v255_v43  ;;  %v270_v48 = vadd.f32 %v259_v30, %v254_v44 }
  0xa0   :  { %v265_v39 = vpop.permute.xlu1 %264  ;;  %v263_v40 = vpop.permute.xlu0 %262 }
  0xa1   :  { %v273_v55 = vadd.f32 %v265_v39, %v257_v51  ;;  %v272_v56 = vadd.f32 %v263_v40, %v256_v52  ;;  %v1671_v39 = vmov 0  }
  0xa4   :  { %v277_v49 = vpop.permute.xlu1 %276  ;;  %v275_v50 = vpop.permute.xlu0 %274 }
  0xa5   :  { %v1834_v53 = vadd.f32 %v277_v49, %v271_v47  ;;  %v1836_v54 = vadd.f32 %v275_v50, %v270_v48 }
  0xa7   :  { %805 = vrot.lane.b32.xlu1 %v1834_v53, %s1664_s23  ;;  %803 = vrot.lane.b32.xlu0 %v1836_v54, %s1664_s23 }
  0xa8   :  { %v281_v57 = vpop.permute.xlu1 %280  ;;  %v279_v58 = vpop.permute.xlu0 %278 }
  0xa9   :  { %v1842_v59 = vadd.f32 %v281_v57, %v273_v55  ;;  %v1844_v60 = vadd.f32 %v279_v58, %v272_v56 }
  0xab   :  { %809 = vrot.lane.b32.xlu1 %v1842_v59, %s1664_s23  ;;  %807 = vrot.lane.b32.xlu0 %v1844_v60, %s1664_s23 }
  0xaf   :  { %84 = vrot.lane.b32.xlu1 %v1744_v3, %s1665_s24  ;;  %82 = vrot.lane.b32.xlu0 %v1732_v1, %s1665_s24 }
  0xb3   :  { %88 = vrot.lane.b32.xlu1 %v1739_v2, %s1665_s24  ;;  %86 = vrot.lane.b32.xlu0 %v1727_v0, %s1665_s24 }
  0xb7   :  { %867 = vrot.lane.b32.xlu1 %v271_v47, %s1664_s23  ;;  %865 = vrot.lane.b32.xlu0 %v270_v48, %s1664_s23 }
  0xbb   :  { %871 = vrot.lane.b32.xlu1 %v273_v55, %s1664_s23  ;;  %869 = vrot.lane.b32.xlu0 %v272_v56, %s1664_s23 }
  0xbf   :  { %100 = vrot.lane.b32.xlu1 %v1744_v3, %s1666_s25  ;;  %98 = vrot.lane.b32.xlu0 %v1732_v1, %s1666_s25 }
  0xc3   :  { %104 = vrot.lane.b32.xlu1 %v1739_v2, %s1666_s25  ;;  %102 = vrot.lane.b32.xlu0 %v1727_v0, %s1666_s25 }
  0xc7   :  { %929 = vrot.lane.b32.xlu1 %v255_v43, %s1664_s23  ;;  %927 = vrot.lane.b32.xlu0 %v254_v44, %s1664_s23 }
  0xcb   :  { %933 = vrot.lane.b32.xlu1 %v257_v51, %s1664_s23  ;;  %931 = vrot.lane.b32.xlu0 %v256_v52, %s1664_s23 }
  0xcf   :  { %116 = vrot.lane.b32.xlu1 %v1744_v3, %s1667_s26  ;;  %114 = vrot.lane.b32.xlu0 %v1732_v1, %s1667_s26 }
  0xd3   :  { %120 = vrot.lane.b32.xlu1 %v1739_v2, %s1667_s26  ;;  %118 = vrot.lane.b32.xlu0 %v1727_v0, %s1667_s26  ;;  %s1677_s26 = smov [#allocation2]  }
  0xd7   :  { %991 = vrot.lane.b32.xlu1 %v239_v37, %s1664_s23  ;;  %989 = vrot.lane.b32.xlu0 %v238_v38, %s1664_s23 }
  0xdb   :  { %995 = vrot.lane.b32.xlu1 %v241_v45, %s1664_s23  ;;  %993 = vrot.lane.b32.xlu0 %v240_v46, %s1664_s23 }
  0xde   :  { %v1886_v61 = vpop.xlane.xlu0 %34 }
  0xdf   :  { %132 = vrot.lane.b32.xlu1 %v1744_v3, %s1668_s27  ;;  %130 = vrot.lane.b32.xlu0 %v1732_v1, %s1668_s27  ;;  %v1950_v30 = vsub.f32 %v1886_v61, %v1732_v1  ;;  %v480_v37 = vsub.f32 %v1886_v61, %v1816_v34  ;;  %v310_v50 = vsub.f32 %v1886_v61, %v1798_v26 }
  0xe2   :  { %v1894_v63 = vpop.xlane.xlu0 %38 }
  0xe3   :  { %136 = vrot.lane.b32.xlu1 %v1739_v2, %s1668_s27  ;;  %134 = vrot.lane.b32.xlu0 %v1727_v0, %s1668_s27  ;;  %v1888_v62 = vpop.xlane.xlu1 %36  ;;  %v1958_v40 = vsub.f32 %v1894_v63, %v1727_v0  ;;  %s1551_s27 = sshll.u32 %s1677_s26, 4  ;;  %s1552_s27 = int_to_ptr.vmem [resolvable:$true] %s1551_s27 }
  0xe4   :  { %v1988_v57 = vsub.f32 %v1888_v62, %v1744_v3  ;;  %s1631_s10 = scalar_lea.vmem %s1552_s27, 512  ;;  %p1636_p1 = scmp.lt.s32.totalorder %s1552_s27, %s1552_s27 }
  0xe5   :  { %p1632_p0 = scmp.ne.s32.totalorder %s1552_s27, %s1631_s10  ;;  %p1637_p2 = scmp.lt.s32.totalorder %s1631_s10, %s1631_s10 }
  0xe6   :  { %v1904_v5 = vpop.xlane.xlu0 %40 }
  0xe7   :  { %532 = vrot.lane.b32.xlu1 %v1801_v27, %s1664_s23  ;;  %530 = vrot.lane.b32.xlu0 %v1804_v28, %s1664_s23  ;;  %v1896_v4 = vpop.permute.xlu1 %50  ;;  %v483_v45 = vsub.f32 %v1904_v5, %v1827_v41  ;;  %v1970_v47 = vsub.f32 %v1904_v5, %v1739_v2  ;;  %p1638_p3 = por %p1637_p2, %p1636_p1 }
  0xe9   :  { %p1639_p4 = pnand %p1638_p3, %p1632_p0 }
  0xea   :  { %v53_v7 = vpop.permute.xlu0 %52 }
  0xeb   :  { %536 = vrot.lane.b32.xlu1 %v1819_v35, %s1664_s23  ;;  %534 = vrot.lane.b32.xlu0 %v1822_v36, %s1664_s23  ;;  %v1906_v6 = vpop.permute.xlu1 %54  ;;  %v63_v46 = vadd.f32 %v53_v7, %v1744_v3 }
  0xee   :  { %v291_v9 = vpop.permute.xlu0 %290 }
  0xef   :  { %1057 = vrot.lane.b32.xlu1 %v1813_v33, %s1664_s23  ;;  %1055 = vrot.lane.b32.xlu0 %v1816_v34, %s1664_s23  ;;  %v1910_v8 = vpop.permute.xlu1 %56  ;;  %v302_v14 = vadd.f32 %v291_v9, %v1836_v54  ;;  %v313_v54 = vsub.f32 %v1904_v5, %v1810_v32  ;;  %v64_v9 = vadd.f32 %v1906_v6, %v1727_v0 }
  0xf0   :  { %v65_v55 = vadd.f32 %v1910_v8, %v1739_v2 }
  0xf1   :  { %v753_v17 = vsub.f32 %v1886_v61, %v302_v14 }
  0xf2   :  { %v295_v11 = vpop.permute.xlu0 %294 }
  0xf3   :  { %1061 = vrot.lane.b32.xlu1 %v1827_v41, %s1664_s23  ;;  %1059 = vrot.lane.b32.xlu0 %v1830_v42, %s1664_s23  ;;  %v293_v10 = vpop.permute.xlu1 %292  ;;  %v304_v18 = vadd.f32 %v295_v11, %v1844_v60  ;;  %v1976_v41 = vsub.f32 %v1888_v62, %v63_v46  ;;  %v62_v60 = vadd.f32 %v1896_v4, %v1732_v1 }
  0xf4   :  { %v303_v15 = vadd.f32 %v293_v10, %v1834_v53  ;;  %v2006_v4 = vsub.f32 %v1894_v63, %v64_v9 }
  0xf5   :  { %v755_v25 = vsub.f32 %v1894_v63, %v304_v18  ;;  %v1996_v7 = vsub.f32 %v1886_v61, %v62_v60 }
  0xf6   :  { %v1928_v13 = vpop.permute.xlu0 %66  ;;  %v754_v19 = vsub.f32 %v1888_v62, %v303_v15 }
  0xf7   :  { %148 = vrot.lane.b32.xlu1 %v1744_v3, %s1669_s28  ;;  %146 = vrot.lane.b32.xlu0 %v1732_v1, %s1669_s28  ;;  %v297_v12 = vpop.permute.xlu1 %296  ;;  %v78_v11 = vadd.f32 %v1928_v13, %v62_v60 }
  0xf8   :  { %v305_v20 = vadd.f32 %v297_v12, %v1842_v59 }
  0xf9   :  { %v2021_v18 = vsub.f32 %v1886_v61, %v78_v11 }
  0xfa   :  { %v1942_v21 = vpop.permute.xlu0 %70  ;;  %v756_v27 = vsub.f32 %v1904_v5, %v305_v20 }
  0xfb   :  { %152 = vrot.lane.b32.xlu1 %v1739_v2, %s1669_s28  ;;  %150 = vrot.lane.b32.xlu0 %v1727_v0, %s1669_s28  ;;  %v1934_v16 = vpop.permute.xlu1 %68 }
  0xfc   :  { %v79_v10 = vadd.f32 %v1934_v16, %v63_v46 }
  0xfe   :  { %v2018_v6 = vsub.f32 %v1888_v62, %v79_v10 }
  0xff   :  { %594 = vrot.lane.b32.xlu1 %v1795_v23, %s1664_s23  ;;  %592 = vrot.lane.b32.xlu0 %v1798_v26, %s1664_s23  ;;  %v1944_v24 = vpop.permute.xlu1 %72  ;;  %v1984_v26 = vsub.f32 %v1904_v5, %v65_v55 }
 0x103   :  { %598 = vrot.lane.b32.xlu1 %v1810_v32, %s1664_s23  ;;  %596 = vrot.lane.b32.xlu0 %v1807_v31, %s1664_s23 }
 0x107   :  { %371 = vrot.lane.b32.xlu1 %v1744_v3, %s1664_s23  ;;  %369 = vrot.lane.b32.xlu0 %v1732_v1, %s1664_s23 }
 0x10b   :  { %375 = vrot.lane.b32.xlu1 %v1739_v2, %s1664_s23  ;;  %373 = vrot.lane.b32.xlu0 %v1727_v0, %s1664_s23 }
 0x10f   :  { %164 = vrot.lane.b32.xlu1 %v1744_v3, %s1670_s29  ;;  %162 = vrot.lane.b32.xlu0 %v1732_v1, %s1670_s29 }
 0x113   :  { %168 = vrot.lane.b32.xlu1 %v1739_v2, %s1670_s29  ;;  %166 = vrot.lane.b32.xlu0 %v1727_v0, %s1670_s29  ;;  %v81_v0 = vadd.f32 %v1944_v24, %v65_v55 }
 0x117   :  { %769 = vperm.xlu1 %1612, %v754_v19   ;;  %766 = vperm.xlu0 %1611, %v753_v17   ;;  %v80_v17 = vadd.f32 %v1942_v21, %v64_v9 }
 0x119   :  { %v806_v28 = vpop.permute.xlu1 %805  ;;  %v804_v29 = vpop.permute.xlu0 %803  ;;  %v2029_v21 = vsub.f32 %v1894_v63, %v80_v17 }
 0x11a   :  { %v815_v38 = vsub.f32 %v1950_v30, %v804_v29  ;;  %v816_v32 = vsub.f32 %v1988_v57, %v806_v28 }
 0x11b   :  { %775 = vperm.xlu0 %1611, %v756_v27   ;;  %772 = vperm.xlu1 %1612, %v755_v25   ;;  %v2026_v25 = vsub.f32 %v1904_v5, %v81_v0 }
 0x11d   :  { %v810_v35 = vpop.permute.xlu1 %809  ;;  %v808_v36 = vpop.permute.xlu0 %807 }
 0x11e   :  { %v817_v34 = vsub.f32 %v1958_v40, %v808_v36  ;;  %v818_v51 = vsub.f32 %v1970_v47, %v810_v35 }
 0x11f   :  { %493 = vperm.xlu0 %1611, %v480_v37   ;;  %1613 = vset.pattern.permute.xlu1 %v1671_v39 }
 0x120   :  { %828 = vperm.xlu1 %1613, %v815_v38  }
 0x121   :  { %v1960_v43 = vpop.permute.xlu1 %84  ;;  %v1962_v44 = vpop.permute.xlu0 %82 }
 0x122   :  { %v95_v37 = vadd.f32 %v1960_v43, %v79_v10  ;;  %v94_v38 = vadd.f32 %v1962_v44, %v78_v11  ;;  %v482_v10 = vsub.f32 %v1894_v63, %v1830_v42 }
 0x123   :  { %502 = vperm.xlu0 %1611, %v483_v45  }
 0x124   :  { %834 = vperm.xlu1 %1613, %v817_v34  }
 0x125   :  { %v89_v48 = vpop.permute.xlu1 %88  ;;  %v87_v49 = vpop.permute.xlu0 %86 }
 0x126   :  { %v97_v46 = vadd.f32 %v89_v48, %v81_v0 }
 0x127   :  { %323 = vperm.xlu0 %1611, %v310_v50   ;;  %v96_v50 = vadd.f32 %v87_v49, %v80_v17 }
 0x128   :  { %837 = vperm.xlu1 %1613, %v818_v51   ;;  %v2044_v51 = vsub.f32 %v1888_v62, %v95_v37  ;;  %v2052_v44 = vsub.f32 %v1904_v5, %v97_v46 }
 0x129   :  { %v868_v52 = vpop.permute.xlu1 %867  ;;  %v866_v53 = vpop.permute.xlu0 %865  ;;  %v2055_v48 = vsub.f32 %v1894_v63, %v96_v50 }
 0x12a   :  { %v878_v56 = vsub.f32 %v1976_v41, %v868_v52  ;;  %v877_v1 = vsub.f32 %v1996_v7, %v866_v53  ;;  %v2047_v52 = vsub.f32 %v1886_v61, %v94_v38 }
 0x12b   :  { %332 = vperm.xlu0 %1611, %v313_v54  }
 0x12c   :  { %893 = vperm.xlu1 %1613, %v878_v56  }
 0x12d   :  { %v872_v58 = vpop.permute.xlu1 %871  ;;  %v870_v59 = vpop.permute.xlu0 %869 }
 0x12e   :  { %v880_v2 = vsub.f32 %v1984_v26, %v872_v58  ;;  %v879_v15 = vsub.f32 %v2006_v4, %v870_v59 }
 0x12f   :  { %1617 = vset.pattern.permute.xlu0 %v1671_v39 }
 0x130   :  { %831 = vperm.xlu0 %1617, %v816_v32   ;;  %899 = vperm.xlu1 %1613, %v880_v2   ;;  %v481_v2 = vsub.f32 %v1888_v62, %v1813_v33 }
 0x131   :  { %v1998_v8 = vpop.permute.xlu1 %100  ;;  %v2000_v3 = vpop.permute.xlu0 %98 }
 0x132   :  { %v110_v0 = vadd.f32 %v2000_v3, %v94_v38 }
 0x134   :  { %890 = vperm.xlu0 %1617, %v877_v1   ;;  %v1047_v42 = vsub.f32 %v1886_v61, %v110_v0 }
 0x135   :  { %v2010_v12 = vpop.permute.xlu1 %104  ;;  %v2012_v14 = vpop.permute.xlu0 %102 }
 0x138   :  { %896 = vperm.xlu0 %1617, %v879_v15  }
 0x139   :  { %v930_v16 = vpop.permute.xlu1 %929  ;;  %v928_v13 = vpop.permute.xlu0 %927 }
 0x13a   :  { %v940_v19 = vsub.f32 %v2018_v6, %v930_v16  ;;  %v939_v20 = vsub.f32 %v2021_v18, %v928_v13 }
 0x13c   :  { %955 = vperm.xlu1 %1613, %v940_v19   ;;  %952 = vperm.xlu0 %1617, %v939_v20   ;;  %v112_v19 = vadd.f32 %v2012_v14, %v96_v50 }
 0x13d   :  { %v934_v24 = vpop.permute.xlu1 %933  ;;  %v932_v27 = vpop.permute.xlu0 %931 }
 0x13e   :  { %v942_v28 = vsub.f32 %v2026_v25, %v934_v24  ;;  %v941_v29 = vsub.f32 %v2029_v21, %v932_v27  ;;  %v1049_v38 = vsub.f32 %v1894_v63, %v112_v19 }
 0x140   :  { %961 = vperm.xlu1 %1613, %v942_v28   ;;  %958 = vperm.xlu0 %1617, %v941_v29   ;;  %v111_v28 = vadd.f32 %v1998_v8, %v95_v37 }
 0x141   :  { %v2033_v35 = vpop.permute.xlu1 %116  ;;  %v2035_v36 = vpop.permute.xlu0 %114 }
 0x142   :  { %v1048_v14 = vsub.f32 %v1888_v62, %v111_v28 }
 0x145   :  { %v2039_v45 = vpop.permute.xlu1 %120  ;;  %v2041_v34 = vpop.permute.xlu0 %118 }
 0x149   :  { %v992_v53 = vpop.permute.xlu1 %991  ;;  %v990_v54 = vpop.permute.xlu0 %989 }
 0x14a   :  { %v1002_v55 = vsub.f32 %v2044_v51, %v992_v53  ;;  %v1001_v43 = vsub.f32 %v2047_v52, %v990_v54 }
 0x14c   :  { %1017 = vperm.xlu1 %1613, %v1002_v55   ;;  %1014 = vperm.xlu0 %1617, %v1001_v43   ;;  %v113_v55 = vadd.f32 %v2010_v12, %v97_v46 }
 0x14d   :  { %v996_v49 = vpop.permute.xlu1 %995  ;;  %v994_v56 = vpop.permute.xlu0 %993 }
 0x14e   :  { %v1004_v58 = vsub.f32 %v2052_v44, %v996_v49  ;;  %v1003_v59 = vsub.f32 %v2055_v48, %v994_v56  ;;  %v1050_v37 = vsub.f32 %v1904_v5, %v113_v55 }
 0x150   :  { %1023 = vperm.xlu1 %1613, %v1004_v58   ;;  %1020 = vperm.xlu0 %1617, %v1003_v59  }
 0x151   :  { %v2059_v60 = vpop.permute.xlu1 %132  ;;  %v2061_v32 = vpop.permute.xlu0 %130 }
 0x154   :  { %1614 = vset.pattern.permute.xlu1 %v1663_v22 }
 0x155   :  { %v2066_v9 = vpop.permute.xlu1 %136  ;;  %496 = vperm.xlu1 %1614, %v481_v2   ;;  %v2068_v1 = vpop.permute.xlu0 %134 }
 0x159   :  { %v533_v11 = vpop.permute.xlu1 %532  ;;  %499 = vperm.xlu1 %1614, %v482_v10   ;;  %v531_v15 = vpop.permute.xlu0 %530 }
 0x15a   :  { %v543_v17 = vsub.f32 %v1988_v57, %v533_v11  ;;  %v542_v16 = vsub.f32 %v1950_v30, %v531_v15 }
 0x15c   :  { %558 = vperm.xlu0 %1617, %v543_v17   ;;  %v2099_v17 = vadd.f32 %v2033_v35, %v111_v28  ;;  %v128_v35 = vadd.f32 %v2041_v34, %v112_v19  ;;  %v311_v19 = vsub.f32 %v1888_v62, %v1795_v23 }
 0x15d   :  { %v537_v33 = vpop.permute.xlu1 %536  ;;  %1615 = vset.pattern.permute.xlu1 %v1671_v39  ;;  %v535_v13 = vpop.permute.xlu0 %534 }
 0x15e   :  { %555 = vperm.xlu1 %1615, %v542_v16   ;;  %v544_v20 = vsub.f32 %v1958_v40, %v535_v13  ;;  %v545_v3 = vsub.f32 %v1970_v47, %v537_v33  ;;  %v126_v16 = vadd.f32 %v2035_v36, %v110_v0 }
 0x160   :  { %v1113_v36 = vsub.f32 %v1886_v61, %v126_v16 }
 0x161   :  { %v1058_v24 = vpop.permute.xlu1 %1057  ;;  %v1056_v27 = vpop.permute.xlu0 %1055 }
 0x162   :  { %v1067_v29 = vsub.f32 %v1047_v42, %v1056_v27  ;;  %561 = vperm.xlu1 %1615, %v544_v20   ;;  %v1068_v43 = vsub.f32 %v1048_v14, %v1058_v24  ;;  %v1117_v28 = vsub.f32 %v1113_v36, %v531_v15 }
 0x164   :  { %1080 = vperm.xlu0 %1617, %v1067_v29   ;;  %v1114_v29 = vsub.f32 %v1888_v62, %v2099_v17 }
 0x165   :  { %v1062_v53 = vpop.permute.xlu1 %1061  ;;  %v1060_v54 = vpop.permute.xlu0 %1059 }
 0x166   :  { %v1069_v50 = vsub.f32 %v1049_v38, %v1060_v54  ;;  %564 = vperm.xlu1 %1615, %v545_v3   ;;  %v1070_v56 = vsub.f32 %v1050_v37, %v1062_v53  ;;  %v2110_v3 = vadd.f32 %v2039_v45, %v113_v55  ;;  %v1118_v0 = vsub.f32 %v1114_v29, %v533_v11 }
 0x167   :  { %v1115_v53 = vsub.f32 %v1894_v63, %v128_v35 }
 0x168   :  { %1086 = vperm.xlu0 %1617, %v1069_v50   ;;  %v1116_v38 = vsub.f32 %v1904_v5, %v2110_v3  ;;  %v314_v50 = vlaneseq }
 0x169   :  { %v2084_v49 = vpop.permute.xlu1 %148  ;;  %v2086_v8 = vpop.permute.xlu0 %146  ;;  %v1119_v55 = vsub.f32 %v1115_v53, %v535_v13  ;;  %v312_v13 = vsub.f32 %v1894_v63, %v1807_v31 }
 0x16a   :  { %1083 = vperm.xlu1 %1615, %v1068_v43   ;;  %v1120_v45 = vsub.f32 %v1116_v38, %v537_v33  ;;  %v335_v43 = vand.u32 127, %v314_v50  ;;  %v2141_v23 = vshrl.u32 %v314_v50, 7 }
 0x16d   :  { %v2089_v58 = vpop.permute.xlu1 %152  ;;  %v2091_v59 = vpop.permute.xlu0 %150 }
 0x16e   :  { %1089 = vperm.xlu1 %1615, %v1070_v56  }
 0x171   :  { %v2093_v12 = vpop.permute.xlu1 %594  ;;  %v593_v46 = vpop.permute.xlu0 %592 }
 0x172   :  { %v605_v2 = vsub.f32 %v1976_v41, %v2093_v12  ;;  %v604_v10 = vsub.f32 %v1996_v7, %v593_v46 }
 0x174   :  { %620 = vperm.xlu1 %1615, %v605_v2   ;;  %617 = vperm.xlu0 %1617, %v604_v10   ;;  %v340_v2 = vadd.s32 4294967288, %v335_v43 }
 0x175   :  { %v2102_v20 = vpop.permute.xlu1 %598  ;;  %v597_v42 = vpop.permute.xlu0 %596 }
 0x176   :  { %v607_v24 = vsub.f32 %v1984_v26, %v2102_v20  ;;  %v606_v27 = vsub.f32 %v2006_v4, %v597_v42 }
 0x178   :  { %626 = vperm.xlu1 %1615, %v607_v24   ;;  %623 = vperm.xlu0 %1617, %v606_v27   ;;  %v2156_v27 = vsub.s32 %v335_v43, %v2141_v23 }
 0x179   :  { %v2117_v54 = vpop.permute.xlu1 %371  ;;  %v2119_v14 = vpop.permute.xlu0 %369 }
 0x17a   :  { %v382_v34 = vsub.f32 %v1988_v57, %v2117_v54  ;;  %v654_v33 = vsub.f32 %v2021_v18, %v2119_v14  ;;  %v142_v57 = vadd.f32 %v2061_v32, %v126_v16  ;;  %v144_v18 = vadd.f32 %v2068_v1, %v128_v35 }
 0x17b   :  { %v381_v31 = vsub.f32 %v1950_v30, %v2119_v14 }
 0x17c   :  { %1133 = vperm.xlu1 %1615, %v1118_v0   ;;  %1130 = vperm.xlu0 %1617, %v1117_v28   ;;  %v1163_v10 = vsub.f32 %v1886_v61, %v142_v57  ;;  %v1165_v1 = vsub.f32 %v1894_v63, %v144_v18 }
 0x17d   :  { %v2123_v11 = vpop.permute.xlu1 %375  ;;  %v2125_v15 = vpop.permute.xlu0 %373 }
 0x17e   :  { %v1167_v32 = vsub.f32 %v1163_v10, %v593_v46  ;;  %v383_v30 = vsub.f32 %v1958_v40, %v2125_v15  ;;  %v1169_v29 = vsub.f32 %v1165_v1, %v597_v42  ;;  %v384_v0 = vsub.f32 %v1970_v47, %v2123_v11 }
 0x17f   :  { %v143_v47 = vadd.f32 %v2059_v60, %v2099_v17  ;;  %v158_v60 = vadd.f32 %v2086_v8, %v142_v57 }
 0x180   :  { %1139 = vperm.xlu1 %1615, %v1120_v45   ;;  %1136 = vperm.xlu0 %1617, %v1119_v55   ;;  %v655_v45 = vsub.f32 %v2018_v6, %v2117_v54  ;;  %v145_v6 = vadd.f32 %v2066_v9, %v2110_v3  ;;  %v160_v3 = vadd.f32 %v2091_v59, %v144_v18  ;;  %v2206_v59 = vsub.s32 1, %v2141_v23 }
 0x181   :  { %v2135_v37 = vpop.permute.xlu1 %164  ;;  %v2137_v56 = vpop.permute.xlu0 %162 }
 0x184   :  { %1616 = vset.pattern.permute.xlu1 %v1663_v22  ;;  %397 = vperm.xlu0 %1617, %v382_v34   ;;  %v656_v22 = vsub.f32 %v2029_v21, %v2125_v15  ;;  %v2153_v21 = vsub.s32 %v340_v2, %v2141_v23 }
 0x185   :  { %326 = vperm.xlu1 %1616, %v311_v19   ;;  %v2148_v16 = vpop.permute.xlu1 %168  ;;  %v2150_v24 = vpop.permute.xlu0 %166 }
 0x188   :  { %667 = vperm.xlu0 %1617, %v654_v33   ;;  %v657_v33 = vsub.f32 %v2026_v25, %v2123_v11 }
 0x189   :  { %329 = vperm.xlu1 %1616, %v312_v13  }
 0x18c   :  { %673 = vperm.xlu0 %1617, %v656_v22   ;;  %v1166_v22 = vsub.f32 %v1904_v5, %v145_v6 }
 0x18d   :  { %1618 = vset.pattern.permute.xlu1 %v1671_v39 }
 0x18e   :  { %394 = vperm.xlu1 %1618, %v381_v31   ;;  %v1170_v2 = vsub.f32 %v1166_v22, %v2102_v20  ;;  %v1215_v31 = vsub.f32 %v1894_v63, %v160_v3 }
 0x190   :  { %1180 = vperm.xlu0 %1617, %v1167_v32   ;;  %v2203_v32 = vsub.s32 0, %v2141_v23  ;;  %v1219_v20 = vsub.f32 %v1215_v31, %v2125_v15  ;;  %v176_v15 = vadd.f32 %v2150_v24, %v160_v3  ;;  %v159_v24 = vadd.f32 %v2084_v49, %v143_v47  ;;  %v1562_v49 = vld [vmem:[%s2460_s3] ss:$0 sm:$0xff] }
 0x192   :  { %v770_v39 = vpop.permute.xlu1 %769  ;;  %400 = vperm.xlu1 %1618, %v383_v30   ;;  %v767_v46 = vpop.permute.xlu0 %766 }
 0x193   :  { %v784_v35 = vrot.slane %v770_v39, %v2153_v21  ;;  %v780_v36 = vrot.slane %v767_v46, %v2156_v27 }
 0x194   :  { %1186 = vperm.xlu0 %1617, %v1169_v29  }
 0x195   :  { %v785_v28 = vsel %vm345_vm0, %v784_v35, %v780_v36 }
 0x196   :  { %v773_v38 = vpop.permute.xlu1 %772  ;;  %403 = vperm.xlu1 %1618, %v384_v0   ;;  %v776_v53 = vpop.permute.xlu0 %775  ;;  %v2228_v0 = vsub.s32 2, %v2141_v23 }
 0x197   :  { %v789_v40 = vrot.slane %v773_v38, %v2156_v27  ;;  %v793_v42 = vrot.slane %v776_v53, %v2153_v21 }
 0x198   :  { %440 = vperm.xlu0 %1617, %v1996_v7   ;;  %v1164_v7 = vsub.f32 %v1888_v62, %v143_v47  ;;  %v161_v47 = vadd.f32 %v2089_v58, %v145_v6 }
 0x199   :  { %v794_v55 = vsel %vm345_vm0, %v793_v42, %v789_v40  ;;  %v1265_v42 = vsub.f32 %v1894_v63, %v176_v15  ;;  %v1214_v63 = vsub.f32 %v1888_v62, %v159_v24 }
 0x19a   :  { %v795_v34 = vsel %vm356_vm1, %v794_v55, %v785_v28  ;;  %670 = vperm.xlu1 %1618, %v655_v45   ;;  %v2175_v19 = vpop.permute.xlu0 %493  ;;  %v1168_v43 = vsub.f32 %v1164_v7, %v2093_v12  ;;  %v1216_v58 = vsub.f32 %v1904_v5, %v161_v47 }
 0x19b   :  { %v829_v50 = vpop.permute.xlu1 %828  ;;  %v1218_v22 = vsub.f32 %v1214_v63, %v2117_v54 }
 0x19c   :  { %446 = vperm.xlu0 %1617, %v2006_v4   ;;  %v1213_v4 = vsub.f32 %v1886_v61, %v158_v60  ;;  %v842_v29 = vrot.slane %v829_v50, %v2156_v27  ;;  %v1220_v54 = vsub.f32 %v1216_v58, %v2123_v11  ;;  %v1673_v11 = vmov 3  }
 0x19e   :  { %676 = vperm.xlu1 %1618, %v657_v33   ;;  %v2183_v13 = vpop.permute.xlu0 %502 }
 0x19f   :  { %v835_v17 = vpop.permute.xlu1 %834 }
 0x1a0   :  { %713 = vperm.xlu0 %1617, %v2047_v52   ;;  %v851_v10 = vrot.slane %v835_v17, %v2156_v27  ;;  %v1217_v52 = vsub.f32 %v1213_v4, %v2119_v14  ;;  %v174_v14 = vadd.f32 %v2137_v56, %v158_v60 }
 0x1a2   :  { %1183 = vperm.xlu1 %1618, %v1168_v43   ;;  %v2189_v25 = vpop.permute.xlu0 %323  ;;  %v1263_v35 = vsub.f32 %v1886_v61, %v174_v14  ;;  %v486_v43 = vsub.s32 3, %v2141_v23 }
 0x1a3   :  { %v838_v9 = vpop.permute.xlu1 %837 }
 0x1a4   :  { %v855_v8 = vrot.slane %v838_v9, %v2153_v21  ;;  %719 = vperm.xlu0 %1617, %v2055_v48   ;;  %v2211_v48 = vld [vmem:[%s2458_s1 + $0x8] sm:$0xff] }
 0x1a5   :  { %v760_v30 = vrot.slane %v2211_v48, %v2203_v32  ;;  %v822_v39 = vrot.slane %v2211_v48, %v2206_v59 }
 0x1a6   :  { %v856_v12 = vsel %vm345_vm0, %v855_v8, %v851_v10  ;;  %1189 = vperm.xlu1 %1618, %v1170_v2   ;;  %v2199_v57 = vpop.permute.xlu0 %332  ;;  %v946_v10 = vrot.slane %v2211_v48, %v486_v43 }
 0x1a7   :  { %v894_v18 = vpop.permute.xlu1 %893  ;;  %v797_v28 = vmul.f32 %v795_v34, %v760_v30  ;;  %v884_v34 = vrot.slane %v2211_v48, %v2228_v0  ;;  %v177_v30 = vadd.f32 %v2148_v16, %v161_v47  ;;  %v520_v47 = vrot.slane %v2183_v13, %v2153_v21  ;;  %v2296_v13 = vld [vmem:[%s2458_s1] sm:$0xff] }
 0x1a8   :  { %1230 = vperm.xlu0 %1617, %v1217_v52   ;;  %v908_v38 = vrot.slane %v894_v18, %v2153_v21  ;;  %v175_v52 = vadd.f32 %v2135_v37, %v159_v24 }
 0x1aa   :  { %443 = vperm.xlu1 %1618, %v1976_v41  }
 0x1ab   :  { %v832_v1 = vpop.permute.xlu0 %831  ;;  %v900_v61 = vpop.permute.xlu1 %899 }
 0x1ac   :  { %v846_v46 = vrot.slane %v832_v1, %v2153_v21  ;;  %1236 = vperm.xlu0 %1617, %v1219_v20   ;;  %v917_v50 = vrot.slane %v900_v61, %v2153_v21  ;;  %v1672_v20 = vmov 2   ;;  %v1264_v1 = vsub.f32 %v1888_v62, %v175_v52 }
 0x1ae   :  { %v847_v56 = vsel %vm345_vm0, %v846_v46, %v842_v29  ;;  %449 = vperm.xlu1 %1618, %v1984_v26  }
 0x1af   :  { %v857_v41 = vsel %vm356_vm1, %v856_v12, %v847_v56  ;;  %v891_v36 = vpop.permute.xlu0 %890 }
 0x1b0   :  { %v859_v53 = vmul.f32 %v857_v41, %v822_v39  ;;  %v904_v40 = vrot.slane %v891_v36, %v2156_v27  ;;  %1276 = vperm.xlu0 %1617, %v1263_v35   ;;  %v1266_v39 = vsub.f32 %v1904_v5, %v177_v30  ;;  %v548_v41 = vsub.s32 4, %v2141_v23 }
 0x1b1   :  { %v1674_v36 = vmov 1  }
 0x1b2   :  { %v860_v45 = vadd.f32 %v859_v53, %v797_v28  ;;  %v909_v26 = vsel %vm345_vm0, %v908_v38, %v904_v40  ;;  %716 = vperm.xlu1 %1618, %v2044_v51   ;;  %v1008_v5 = vrot.slane %v2211_v48, %v548_v41 }
 0x1b3   :  { %v897_v55 = vpop.permute.xlu0 %896 }
 0x1b4   :  { %v913_v33 = vrot.slane %v897_v55, %v2156_v27  ;;  %1282 = vperm.xlu0 %1617, %v1265_v42  }
 0x1b6   :  { %v918_v7 = vsel %vm345_vm0, %v917_v50, %v913_v33  ;;  %722 = vperm.xlu1 %1618, %v2052_v44   ;;  %v1675_v50 = vmov 0.0  }
 0x1b7   :  { %v919_v51 = vsel %vm356_vm1, %v918_v7, %v909_v26  ;;  %v956_v60 = vpop.permute.xlu1 %955  ;;  %v953_v17 = vpop.permute.xlu0 %952  ;;  %v507_v26 = vrot.slane %v2175_v19, %v2156_v27  ;;  %1573 = vmatprep.subr.mxu0 %v1675_v50  ;;  %1580 = vmatprep.subr.mxu1 %v1675_v50 }
 0x1b8   :  { %v921_v4 = vmul.f32 %v919_v51, %v884_v34  ;;  %v970_v9 = vrot.slane %v956_v60, %v2153_v21  ;;  %v966_v3 = vrot.slane %v953_v17, %v2156_v27  ;;  %1323 = vperm.xlu0 %1617, %v1562_v49   ;;  %1577 = vmatprep.mubr.msk.f32.mxu0 %vm1676_vm2, %v1675_v50 }
 0x1b9   :  { %1582 = vmatprep.mubr.msk.f32.mxu1 %vm1676_vm2, %v1675_v50 }
 0x1ba   :  { %v922_v6 = vadd.f32 %v921_v4, %v860_v45  ;;  %v971_v2 = vsel %vm345_vm0, %v970_v9, %v966_v3  ;;  %1233 = vperm.xlu1 %1618, %v1218_v22   ;;  %v1345_v45 = vld [vmem:[%s2461_s4 + $0x8] sm:$0xff] }
 0x1bb   :  { %v962_v44 = vpop.permute.xlu1 %961  ;;  %v959_v8 = vpop.permute.xlu0 %958  ;;  %1574 = vmatpush3.msra.mxu0 %v1345_v45 }
 0x1bc   :  { %v979_v12 = vrot.slane %v962_v44, %v2153_v21  ;;  %v975_v31 = vrot.slane %v959_v8, %v2156_v27  ;;  %1620 = vset.pattern.permute.xlu0 %v1672_v20  ;;  %1575 = vmatprep.subr.mxu0 %v1675_v50 }
 0x1bd   :  { %1334 = vperm.xlu0 %1620, %v1562_v49  }
 0x1be   :  { %v980_v14 = vsel %vm345_vm0, %v979_v12, %v975_v31  ;;  %1239 = vperm.xlu1 %1618, %v1220_v54   ;;  %v610_v31 = vsub.s32 5, %v2141_v23 }
 0x1bf   :  { %v981_v18 = vsel %vm356_vm1, %v980_v14, %v971_v2  ;;  %v487_v2 = vrot.slane %v2296_v13, %v486_v43 }
 0x1c0   :  { %v983_v29 = vmul.f32 %v981_v18, %v946_v10  ;;  %v549_v10 = vrot.slane %v2296_v13, %v548_v41 }
 0x1c1   :  { %1622 = vset.pattern.permute.xlu0 %v1673_v11 }
 0x1c2   :  { %v984_v37 = vadd.f32 %v983_v29, %v922_v6  ;;  %1279 = vperm.xlu1 %1618, %v1264_v1  }
 0x1c6   :  { %1285 = vperm.xlu1 %1618, %v1266_v39   ;;  %v1074_v39 = vrot.slane %v2211_v48, %v610_v31 }
 0x1c7   :  { %v1018_v46 = vpop.permute.xlu1 %1017  ;;  %v1015_v35 = vpop.permute.xlu0 %1014 }
 0x1c8   :  { %v1032_v15 = vrot.slane %v1018_v46, %v2153_v21  ;;  %v1028_v56 = vrot.slane %v1015_v35, %v2156_v27 }
 0x1ca   :  { %v1033_v62 = vsel %vm345_vm0, %v1032_v15, %v1028_v56  ;;  %1619 = vset.pattern.permute.xlu1 %v1674_v36 }
 0x1cb   :  { %v1024_v16 = vpop.permute.xlu1 %1023  ;;  %1328 = vperm.xlu1 %1619, %v1562_v49   ;;  %v1021_v28 = vpop.permute.xlu0 %1020 }
 0x1cc   :  { %v1041_v38 = vrot.slane %v1024_v16, %v2153_v21  ;;  %v1037_v53 = vrot.slane %v1021_v28, %v2156_v27 }
 0x1ce   :  { %v1042_v40 = vsel %vm345_vm0, %v1041_v38, %v1037_v53 }
 0x1cf   :  { %v1043_v61 = vsel %vm356_vm1, %v1042_v40, %v1033_v62  ;;  %1621 = vset.pattern.permute.xlu1 %v1673_v11  ;;  %v611_v40 = vrot.slane %v2296_v13, %v610_v31 }
 0x1d0   :  { %v1045_v24 = vmul.f32 %v1043_v61, %v1008_v5  ;;  %v497_v42 = vpop.permute.xlu1 %496  ;;  %1340 = vperm.xlu1 %1621, %v1562_v49   ;;  %v1344_v49 = vld [vmem:[%s2461_s4] sm:$0xff] }
 0x1d1   :  { %v511_v55 = vrot.slane %v497_v42, %v2153_v21  ;;  %1576 = vmatpush3.msra.mxu0 %v1344_v49 }
 0x1d2   :  { %v1046_v34 = vadd.f32 %v1045_v24, %v984_v37 }
 0x1d3   :  { %v512_v33 = vsel %vm345_vm0, %v511_v55, %v507_v26 }
 0x1d4   :  { %v500_v63 = vpop.permute.xlu1 %499 }
 0x1d5   :  { %v516_v19 = vrot.slane %v500_v63, %v2156_v27 }
 0x1d7   :  { %v521_v7 = vsel %vm345_vm0, %v520_v47, %v516_v19  ;;  %v559_v51 = vpop.permute.xlu0 %558 }
 0x1d8   :  { %v522_v60 = vsel %vm356_vm1, %v521_v7, %v512_v33  ;;  %v573_v22 = vrot.slane %v559_v51, %v2153_v21 }
 0x1d9   :  { %v556_v17 = vpop.permute.xlu1 %555  ;;  %v524_v20 = vmul.f32 %v522_v60, %v487_v2 }
 0x1da   :  { %v569_v4 = vrot.slane %v556_v17, %v2156_v27 }
 0x1dc   :  { %v574_v9 = vsel %vm345_vm0, %v573_v22, %v569_v4 }
 0x1dd   :  { %v562_v3 = vpop.permute.xlu1 %561 }
 0x1de   :  { %v578_v44 = vrot.slane %v562_v3, %v2156_v27 }
 0x1df   :  { %v1081_v58 = vpop.permute.xlu0 %1080 }
 0x1e0   :  { %v1094_v14 = vrot.slane %v1081_v58, %v2156_v27 }
 0x1e1   :  { %v565_v6 = vpop.permute.xlu1 %564 }
 0x1e2   :  { %v582_v8 = vrot.slane %v565_v6, %v2153_v21 }
 0x1e3   :  { %v1087_v43 = vpop.permute.xlu0 %1086 }
 0x1e4   :  { %v583_v54 = vsel %vm345_vm0, %v582_v8, %v578_v44  ;;  %v1103_v37 = vrot.slane %v1087_v43, %v2156_v27  ;;  %v339_v8 = vrot.slane %v2189_v25, %v2156_v27 }
 0x1e5   :  { %v584_v52 = vsel %vm356_vm1, %v583_v54, %v574_v9  ;;  %v1084_v12 = vpop.permute.xlu1 %1083  ;;  %v354_v54 = vrot.slane %v2199_v57, %v2153_v21 }
 0x1e6   :  { %v586_v18 = vmul.f32 %v584_v52, %v549_v10  ;;  %v1098_v1 = vrot.slane %v1084_v12, %v2153_v21 }
 0x1e8   :  { %v587_v30 = vadd.f32 %v586_v18, %v524_v20  ;;  %v1099_v29 = vsel %vm345_vm0, %v1098_v1, %v1094_v14 }
 0x1e9   :  { %v1090_v11 = vpop.permute.xlu1 %1089 }
 0x1ea   :  { %v1107_v46 = vrot.slane %v1090_v11, %v2153_v21 }
 0x1ec   :  { %v1108_v35 = vsel %vm345_vm0, %v1107_v46, %v1103_v37 }
 0x1ed   :  { %v1109_v15 = vsel %vm356_vm1, %v1108_v35, %v1099_v29 }
 0x1ee   :  { %v1111_v56 = vmul.f32 %v1109_v15, %v1074_v39 }
 0x1ef   :  { %v621_v41 = vpop.permute.xlu1 %620  ;;  %v618_v62 = vpop.permute.xlu0 %617 }
 0x1f0   :  { %v1112_v36 = vadd.f32 %v1111_v56, %v1046_v34  ;;  %v635_v16 = vrot.slane %v621_v41, %v2153_v21  ;;  %v631_v28 = vrot.slane %v618_v62, %v2156_v27  ;;  %v660_v34 = vsub.s32 6, %v2141_v23 }
 0x1f2   :  { %v636_v24 = vsel %vm345_vm0, %v635_v16, %v631_v28  ;;  %v1124_v51 = vrot.slane %v2211_v48, %v660_v34 }
 0x1f3   :  { %v627_v38 = vpop.permute.xlu1 %626  ;;  %v624_v5 = vpop.permute.xlu0 %623 }
 0x1f4   :  { %v644_v53 = vrot.slane %v627_v38, %v2153_v21  ;;  %v640_v61 = vrot.slane %v624_v5, %v2156_v27 }
 0x1f6   :  { %v645_v42 = vsel %vm345_vm0, %v644_v53, %v640_v61 }
 0x1f7   :  { %v646_v45 = vsel %vm356_vm1, %v645_v42, %v636_v24  ;;  %v1134_v26 = vpop.permute.xlu1 %1133  ;;  %v1131_v55 = vpop.permute.xlu0 %1130 }
 0x1f8   :  { %v648_v50 = vmul.f32 %v646_v45, %v611_v40  ;;  %v1148_v33 = vrot.slane %v1134_v26, %v2153_v21  ;;  %v1144_v63 = vrot.slane %v1131_v55, %v2156_v27  ;;  %v388_v26 = vrot.slane %v2296_v13, %v2206_v59 }
 0x1fa   :  { %v2326_v49 = vadd.f32 %v648_v50, %v587_v30  ;;  %v1149_v17 = vsel %vm345_vm0, %v1148_v33, %v1144_v63 }
 0x1fb   :  { %v1140_v47 = vpop.permute.xlu1 %1139  ;;  %v1137_v19 = vpop.permute.xlu0 %1136 }
 0x1fc   :  { %v1157_v7 = vrot.slane %v1140_v47, %v2153_v21  ;;  %v1153_v60 = vrot.slane %v1137_v19, %v2156_v27 }
 0x1fe   :  { %v1158_v22 = vsel %vm345_vm0, %v1157_v7, %v1153_v60  ;;  %v317_v7 = vrot.slane %v2296_v13, %v2203_v32 }
 0x1ff   :  { %v1159_v4 = vsel %vm356_vm1, %v1158_v22, %v1149_v17  ;;  %v398_v9 = vpop.permute.xlu0 %397  ;;  %v661_v17 = vrot.slane %v2296_v13, %v660_v34 }
 0x200   :  { %v1161_v3 = vmul.f32 %v1159_v4, %v1124_v51  ;;  %v327_v58 = vpop.permute.xlu1 %326  ;;  %v412_v38 = vrot.slane %v398_v9, %v2153_v21  ;;  %v434_v4 = vrot.slane %v2296_v13, %v2228_v0 }
 0x201   :  { %v344_v2 = vrot.slane %v327_v58, %v2153_v21 }
 0x202   :  { %v2336_v6 = vadd.f32 %v1161_v3, %v1112_v36  ;;  %v706_v3 = vsub.s32 7, %v2141_v23 }
 0x203   :  { %v668_v44 = vpop.permute.xlu0 %667  ;;  %v346_v12 = vsel %vm345_vm0, %v344_v2, %v339_v8 }
 0x204   :  { %v330_v10 = vpop.permute.xlu1 %329  ;;  %v681_v45 = vrot.slane %v668_v44, %v2156_v27 }
 0x205   :  { %v350_v52 = vrot.slane %v330_v10, %v2156_v27 }
 0x207   :  { %v355_v31 = vsel %vm345_vm0, %v354_v54, %v350_v52  ;;  %v674_v20 = vpop.permute.xlu0 %673  ;;  %v707_v52 = vrot.slane %v2296_v13, %v706_v3 }
 0x208   :  { %v357_v14 = vsel %vm356_vm1, %v355_v31, %v346_v12  ;;  %v690_v5 = vrot.slane %v674_v20, %v2156_v27 }
 0x209   :  { %v395_v18 = vpop.permute.xlu1 %394  ;;  %v359_v12 = vmul.f32 %v357_v14, %v317_v7 }
 0x20a   :  { %v408_v62 = vrot.slane %v395_v18, %v2156_v27 }
 0x20b   :  { %v2347_v1 = vpop.permute.xlu0 %1180 }
 0x20c   :  { %v413_v55 = vsel %vm345_vm0, %v412_v38, %v408_v62 }
 0x20d   :  { %v401_v43 = vpop.permute.xlu1 %400 }
 0x20e   :  { %v417_v36 = vrot.slane %v401_v43, %v2156_v27 }
 0x20f   :  { %v2349_v30 = vpop.permute.xlu0 %1186 }
 0x210   :  { %v1203_v13 = vrot.slane %v2349_v30, %v2156_v27 }
 0x211   :  { %v404_v29 = vpop.permute.xlu1 %403 }
 0x212   :  { %v421_v56 = vrot.slane %v404_v29, %v2153_v21 }
 0x213   :  { %v441_v25 = vpop.permute.xlu0 %440 }
 0x214   :  { %v422_v40 = vsel %vm345_vm0, %v421_v56, %v417_v36  ;;  %v454_v50 = vrot.slane %v441_v25, %v2156_v27  ;;  %v309_v56 = vld [vmem:[%s2459_s2] sm:$0x7] }
 0x215   :  { %v671_v11 = vpop.permute.xlu1 %670  ;;  %v423_v51 = vsel %vm356_vm1, %v422_v40, %v413_v55 }
 0x216   :  { %v685_v61 = vrot.slane %v671_v11, %v2153_v21  ;;  %v425_v44 = vmul.f32 %v423_v51, %v388_v26 }
 0x217   :  { %v447_v57 = vpop.permute.xlu0 %446 }
 0x218   :  { %v463_v24 = vrot.slane %v447_v57, %v2156_v27  ;;  %v686_v60 = vsel %vm345_vm0, %v685_v61, %v681_v45  ;;  %v426_v25 = vadd.f32 %v425_v44, %v359_v12  ;;  %v750_v45 = vrot.slane %v309_v56, %v2206_v59 }
 0x219   :  { %v677_v37 = vpop.permute.xlu1 %676 }
 0x21a   :  { %v694_v16 = vrot.slane %v677_v37, %v2153_v21 }
 0x21b   :  { %v714_v46 = vpop.permute.xlu0 %713 }
 0x21c   :  { %v695_v33 = vsel %vm345_vm0, %v694_v16, %v690_v5  ;;  %v727_v8 = vrot.slane %v714_v46, %v2156_v27  ;;  %v308_v5 = vld [vmem:[%s2458_s1 + $0x10] sm:$0x3] }
 0x21d   :  { %v2351_v39 = vpop.permute.xlu1 %1183  ;;  %v696_v9 = vsel %vm356_vm1, %v695_v33, %v686_v60  ;;  %v1270_v60 = vrot.slane %v308_v5, %v2206_v59 }
 0x21e   :  { %v698_v31 = vmul.f32 %v696_v9, %v661_v17  ;;  %v1198_v14 = vrot.slane %v2351_v39, %v2153_v21  ;;  %v477_v39 = vrot.slane %v309_v56, %v2203_v32 }
 0x21f   :  { %v720_v41 = vpop.permute.xlu0 %719 }
 0x220   :  { %v736_v54 = vrot.slane %v720_v41, %v2156_v27  ;;  %v1194_v41 = vrot.slane %v2347_v1, %v2156_v27 }
 0x221   :  { %v1190_v35 = vpop.permute.xlu1 %1189 }
 0x222   :  { %v1207_v37 = vrot.slane %v1190_v35, %v2153_v21  ;;  %v1199_v1 = vsel %vm345_vm0, %v1198_v14, %v1194_v41  ;;  %v1565_v41 = vld [vmem:[%s2464_s7] ss:$0 sm:$0xff] }
 0x223   :  { %v1231_v63 = vpop.permute.xlu0 %1230 }
 0x224   :  { %v1208_v16 = vsel %vm345_vm0, %v1207_v37, %v1203_v13  ;;  %v1244_v40 = vrot.slane %v1231_v63, %v2156_v27 }
 0x225   :  { %v444_v15 = vpop.permute.xlu1 %443 }
 0x226   :  { %v458_v42 = vrot.slane %v444_v15, %v2153_v21  ;;  %v699_v15 = vadd.f32 %v698_v31, %v2326_v49 }
 0x227   :  { %v1237_v20 = vpop.permute.xlu0 %1236 }
 0x228   :  { %v459_v22 = vsel %vm345_vm0, %v458_v42, %v454_v50  ;;  %v1253_v49 = vrot.slane %v1237_v20, %v2156_v27  ;;  %v1224_v50 = vrot.slane %v308_v5, %v2203_v32 }
 0x229   :  { %v450_v28 = vpop.permute.xlu1 %449 }
 0x22a   :  { %v467_v53 = vrot.slane %v450_v28, %v2153_v21 }
 0x22b   :  { %v1277_v62 = vpop.permute.xlu0 %1276 }
 0x22c   :  { %v468_v47 = vsel %vm345_vm0, %v467_v53, %v463_v24  ;;  %v1174_v53 = vrot.slane %v2211_v48, %v706_v3  ;;  %v1209_v24 = vsel %vm356_vm1, %v1208_v16, %v1199_v1  ;;  %v1290_v17 = vrot.slane %v1277_v62, %v2156_v27 }
 0x22d   :  { %v717_v19 = vpop.permute.xlu1 %716  ;;  %v469_v58 = vsel %vm356_vm1, %v468_v47, %v459_v22 }
 0x22e   :  { %v731_v2 = vrot.slane %v717_v19, %v2153_v21  ;;  %v471_v18 = vmul.f32 %v469_v58, %v434_v4  ;;  %v1211_v7 = vmul.f32 %v1209_v24, %v1174_v53  ;;  %v1627_v53 = vld [vmem:[%s2457_s0 + $0x8] sm:$0xff] }
 0x22f   :  { %v1283_v33 = vpop.permute.xlu0 %1282 }
 0x230   :  { %v732_v23 = vsel %vm345_vm0, %v731_v2, %v727_v8  ;;  %v472_v46 = vadd.f32 %v471_v18, %v426_v25  ;;  %v1299_v22 = vrot.slane %v1283_v33, %v2156_v27  ;;  %v1212_v44 = vadd.f32 %v1211_v7, %v2336_v6 }
 0x231   :  { %v723_v10 = vpop.permute.xlu1 %722  ;;  %v1313_v18 = vrot.slane %v309_v56, %v2228_v0  ;;  %v1563_v0 = vld [vmem:[%s2462_s5] ss:$0 sm:$0xff] }
 0x232   :  { %v740_v34 = vrot.slane %v723_v10, %v2153_v21  ;;  %v473_v38 = vmul.f32 0.033333335, %v472_v46  ;;  %v1428_v46 = vld [vmem:[%s2463_s6] sm:$0xff] }
 0x233   :  { %1581 = vmatpush3.msra.mxu1 %v1428_v46 }
 0x234   :  { %v741_v43 = vsel %vm345_vm0, %v740_v34, %v736_v54  ;;  %v478_v47 = vadd.f32 %v477_v39, %v473_v38  ;;  %v1324_v54 = vpop.permute.xlu0 %1323 }
 0x235   :  { %v742_v29 = vsel %vm356_vm1, %v741_v43, %v732_v23  ;;  %v1234_v11 = vpop.permute.xlu1 %1233 }
 0x236   :  { %v744_v57 = vmul.f32 %v742_v29, %v707_v52  ;;  %v1248_v28 = vrot.slane %v1234_v11, %v2153_v21  ;;  %v479_v3 = vmax.f32 %v478_v47, 0.0 }
 0x238   :  { %v745_v35 = vadd.f32 %v744_v57, %v699_v15  ;;  %v1249_v55 = vsel %vm345_vm0, %v1248_v28, %v1244_v40  ;;  %v1326_v31 = vmul.f32 %v1324_v54, %v479_v3  ;;  %v1335_v29 = vpop.permute.xlu0 %1334 }
 0x239   :  { %v1240_v36 = vpop.permute.xlu1 %1239 }
 0x23a   :  { %v1257_v30 = vrot.slane %v1240_v36, %v2153_v21  ;;  %v746_v26 = vmul.f32 0.035714287, %v745_v35 }
 0x23c   :  { %v1258_v61 = vsel %vm345_vm0, %v1257_v30, %v1253_v49  ;;  %v751_v51 = vadd.f32 %v750_v45, %v746_v26  ;;  %v1630_v26 = vld [vmem:[%s2457_s0 + $0x10] sm:$0xff] }
 0x23d   :  { %v1280_v42 = vpop.permute.xlu1 %1279  ;;  %v1259_v19 = vsel %vm356_vm1, %v1258_v61, %v1249_v55  ;;  %v1628_v61 = vld [vmem:[%s2457_s0] sm:$0xff] }
 0x23e   :  { %v1294_v48 = vrot.slane %v1280_v42, %v2153_v21  ;;  %v1261_v4 = vmul.f32 %v1259_v19, %v1224_v50  ;;  %v752_v8 = vmax.f32 %v751_v51, 0.0  ;;  %v1629_v42 = vld [vmem:[%s2457_s0 + $0x18] sm:$0xff] }
 0x240   :  { %v1295_v58 = vsel %vm345_vm0, %v1294_v48, %v1290_v17  ;;  %v1262_v52 = vadd.f32 %v1261_v4, %v1212_v44 }
 0x241   :  { %v1286_v63 = vpop.permute.xlu1 %1285 }
 0x242   :  { %v1303_v9 = vrot.slane %v1286_v63, %v2153_v21 }
 0x244   :  { %v1304_v2 = vsel %vm345_vm0, %v1303_v9, %v1299_v22 }
 0x245   :  { %v1305_v10 = vsel %vm356_vm1, %v1304_v2, %v1295_v58 }
 0x246   :  { %v1329_v34 = vpop.permute.xlu1 %1328  ;;  %v1307_v12 = vmul.f32 %v1305_v10, %v1270_v60 }
 0x247   :  { %v1331_v20 = vmul.f32 %v1329_v34, %v752_v8 }
 0x248   :  { %v1308_v27 = vadd.f32 %v1307_v12, %v1262_v52 }
 0x249   :  { %v1332_v21 = vadd.f32 %v1331_v20, %v1326_v31 }
 0x24a   :  { %v1309_v23 = vmul.f32 0.04347826, %v1308_v27 }
 0x24b   :  { %v1341_v37 = vpop.permute.xlu1 %1340 }
 0x24c   :  { %v1314_v43 = vadd.f32 %v1313_v18, %v1309_v23 }
 0x24e   :  { %v1315_v25 = vmax.f32 %v1314_v43, 0.0 }
 0x250   :  { %v1337_v11 = vmul.f32 %v1335_v29, %v1315_v25 }
 0x252   :  { %v1338_v6 = vadd.f32 %v1337_v11, %v1332_v21 }
 0x254   :  { %v1343_v57 = vadd.f32 %v1341_v37, %v1338_v6 }
 0x256   :  { %1578 = vmatmul.mubr.msk.f32.vlgmr.msra.gmra.mxu0 %vm1353_vm3, %v1343_v57 }
 0x316   :  { %v1423_v15 = vpop.f32.mrf.mxu0 }
 0x317   :  { %v1424_v13 = vadd.f32 %v1563_v0, %v1423_v15 }
 0x318   :  { %v1579_v14 = vpop.f32.mrf.mxu0 }
 0x319   :  { %v1427_v56 = vmax.f32 %v1424_v13, 0.0 }
 0x31b   :  { %1583 = vmatmul.mubr.msk.f32.vlgmr.msra.gmra.mxu1 %vm1436_vm4, %v1427_v56 }
 0x3db   :  { %v1506_v62 = vpop.f32.mrf.mxu1 }
 0x3dc   :  { %v1507_v36 = vadd.f32 %v1565_v41, %v1506_v62 }
 0x3dd   :  { %v1584_v35 = vpop.f32.mrf.mxu1 }
 0x3de   :  { %v1567_v16 = vmul.f32 -1.442695, %v1507_v36 }
 0x3e0   :  { %1623 = vpow2.f32 %v1567_v16 }
 0x3ed   :  { %v1624_v49 = vpop.eup %1623 }
 0x3ee   :  { %v1513_v28 = vadd.f32 1.0, %v1624_v49 }
 0x3f0   :  { %1625 = vrcp.f32 %v1513_v28 }
 0x3fd   :  { %v1626_v30 = vpop.eup %1625 }
 0x3fe   :  { %v1519_v38 = vrot.slane %v1626_v30, %v2203_v32  ;;  %v1530_v39 = vrot.slane %v1626_v30, %v2206_v59 }
 0x400   :  { %1525 = vbcast.lane.b32.xlu0 %v1519_v38, 264  ;;  %1521 = vbcast.lane.b32.xlu1 %v1519_v38, 256 }
 0x404   :  { %1536 = vbcast.lane.b32.xlu0 %v1530_v39, 264  ;;  %1532 = vbcast.lane.b32.xlu1 %v1530_v39, 256 }
 0x472   :  { %v1526_v5 = vpop.permute.xlu0 %1525  ;;  %v1522_v1 = vpop.permute.xlu1 %1521 }
 0x473   :  { %v1539_v40 = vmul.f32 %v1627_v53, %v1526_v5  ;;  %v1538_v24 = vmul.f32 %v1628_v61, %v1522_v1 }
 0x475   :  { %1543 = vst [vmem:[#allocation2 + $0x8] sm:$0xff] %v1539_v40  ;;  %1542 = vst [vmem:[#allocation2] sm:$0xff] %v1538_v24 }
 0x476   :  { %v1537_v32 = vpop.permute.xlu0 %1536  ;;  %v1533_v59 = vpop.permute.xlu1 %1532 }
 0x477   :  { %v1541_v45 = vmul.f32 %v1629_v42, %v1537_v32  ;;  %v1540_v55 = vmul.f32 %v1630_v26, %v1533_v59 }
 0x479   :  { %1545 = vst [vmem:[#allocation2 + $0x18] sm:$0xff] %v1541_v45  ;;  %1544 = vst [vmem:[#allocation2 + $0x10] sm:$0xff] %v1540_v55 }
 0x47a   :  { %1642 = shalt.err (!%p1639_p4)
}
 0x47b   :  { %s1678_s11 = smov 128  }
 0x47c   :  { %1557 = dma.vmem_to_hbm [thread:$0]  %s1552_s27, 512, %s2465_s8, [#allocation3], %s1678_s11, %s1678_s11, %s1661_s21  }
 0x47d   :  { %1651 = dma.done.wait [#allocation3], 512  }
 0x47e   :  { %1652 = vsyncadd [#allocation3], 4294966784 }
 0x47f   :  { %1561 = vsyncpa [#allocation3], 1 }

</bundles_post_ra>
